<compile_context>
chip_gen: v7x
topology: tpu7x:2x2x1
jax: 0.10.0
libtpu: 0.0.40
codegen_flags: <defaults>
</compile_context>

<pallas_src>
import functools

import jax
import jax.numpy as jnp
from jax.experimental import pallas as pl
from jax.experimental.pallas import tpu as pltpu


def bdqn_kernel(x_ref, w1_ref, b1_ref, w2_ref, b2_ref, w3_ref, b3_ref,
                wh_ref, bh_ref, out_ref, *, relu_bf16):
    # x arrives f32 from HBM; cast to bf16 here (saves a wrapper-side pass).
    x = x_ref[...].astype(jnp.bfloat16)

    def linear_relu(a, w_ref, b_ref):
        acc = jnp.dot(a, w_ref[...], preferred_element_type=jnp.float32) + b_ref[...]
        if relu_bf16:                      # v6e / v7x: bf16 VPU
            return jnp.maximum(acc.astype(jnp.bfloat16), jnp.bfloat16(0.0))
        return jnp.maximum(acc, 0.0).astype(jnp.bfloat16)   # v5e: f32 VPU only

    # Shared trunk: Linear -> ReLU x3 (bf16 MXU inputs, f32 accumulation).
    h = linear_relu(x, w1_ref, b1_ref)
    h = linear_relu(h, w2_ref, b2_ref)
    h = linear_relu(h, w3_ref, b3_ref)

    # Fused dueling heads: columns [0, ac_dim*n) already contain
    # (A - mean(A)) + V folded host-side; remaining lanes are zero padding.
    heads = jnp.dot(h, wh_ref[...], preferred_element_type=jnp.float32) + bh_ref[...]
    out_ref[...] = heads.astype(out_ref.dtype)               # lane-dense bf16 store


def init_params(key, obs, ac_dim, n, l1w, l2w, l3w):
    """Deterministic PyTorch-Linear-like init (uniform(-1/sqrt(fan_in), ...))."""
    ks = jax.random.split(key, 10)

    def lin(kw, kb, fan_in, fan_out):
        bound = 1.0 / jnp.sqrt(fan_in)
        w = jax.random.uniform(kw, (fan_in, fan_out), jnp.float32, -bound, bound)
        b = jax.random.uniform(kb, (1, fan_out), jnp.float32, -bound, bound)
        return w, b

    w1, b1 = lin(ks[0], ks[1], obs, l1w)
    w2, b2 = lin(ks[2], ks[3], l1w, l2w)
    w3, b3 = lin(ks[4], ks[5], l2w, l3w)
    wv, bv = lin(ks[6], ks[7], l3w, 1)
    bound = 1.0 / jnp.sqrt(l3w)
    wadv = jax.random.uniform(ks[8], (ac_dim, l3w, n), jnp.float32, -bound, bound)
    badv = jax.random.uniform(ks[9], (ac_dim, 1, n), jnp.float32, -bound, bound)
    return (w1, b1, w2, b2, w3, b3, wv, bv, wadv, badv)


def pack_params(params, obs, ac_dim, n, lane=128):
    """Host-side packing:
       * zero-pad w1's contraction dim so the x tile is lane-dense (obs -> 128k)
       * fold the full dueling combine  V + A - mean(A)  into one lane-padded
         head matrix:  wh[:, a*n+j] = (wadv[a,:,j] - mean_j) + wv,
                       bh[a*n+j]    = (badv[a,j]  - mean_j) + bv."""
    (w1, b1, w2, b2, w3, b3, wv, bv, wadv, badv) = params
    l3w = w3.shape[1]
    width = ac_dim * n
    pad_width = lane * pl.cdiv(width, lane)
    obs_pad = lane * pl.cdiv(obs, lane)

    w1p = jnp.zeros((obs_pad, w1.shape[1]), jnp.float32).at[:obs, :].set(w1)

    wadv_c = wadv - wadv.mean(axis=2, keepdims=True)          # (ac_dim, l3w, n)
    badv_c = badv - badv.mean(axis=2, keepdims=True)          # (ac_dim, 1, n)
    wh_cols = (jnp.transpose(wadv_c, (1, 0, 2)).reshape(l3w, width)
               + wv)                                          # +V weights, broadcast
    bh_cols = badv_c.reshape(width) + bv[0, 0]                # +V bias

    wh = jnp.zeros((l3w, pad_width), jnp.float32).at[:, :width].set(wh_cols)
    bh = jnp.zeros((1, pad_width), jnp.float32).at[0, :width].set(bh_cols)

    packed = (w1p.astype(jnp.bfloat16), b1,
              w2.astype(jnp.bfloat16), b2,
              w3.astype(jnp.bfloat16), b3,
              wh.astype(jnp.bfloat16), bh)
    return packed, pad_width


def _supports_bf16_vpu():
    """v5e's VPU has no bf16; keep the ReLU in f32 there."""
    try:
        kind = jax.devices()[0].device_kind.lower()
    except Exception:
        return False
    return "v5" not in kind


def _choose_batch_tiling(batch, max_tb=1024):
    """Pick (padded_batch, tile_rows): one tile for tiny batches, otherwise an
    even number of >=128-row tiles (v7x 2-TC sharding), tile capped at max_tb."""
    bp = 128 * pl.cdiv(batch, 128)
    if bp <= 128:
        return bp, bp
    bp = 256 * pl.cdiv(batch, 256)
    tb = min(max_tb, bp // 2)              # multiple of 128 by construction
    bp = (2 * tb) * pl.cdiv(bp, 2 * tb)    # keep nb a multiple of 2
    return bp, tb


def branching_q_forward(x, packed, ac_dim, n, pad_width, *, max_tb=1024):
    (w1, b1, w2, b2, w3, b3, wh, bh) = packed
    batch, obs = x.shape
    obs_pad = w1.shape[0]
    l1w, l2w, l3w = w1.shape[1], w2.shape[1], w3.shape[1]

    bp, tb = _choose_batch_tiling(batch, max_tb)
    nb = bp // tb
    # Single wrapper-side pad (ragged batch rows + obs lanes); bf16 cast of x
    # happens inside the kernel so HBM reads x exactly once.
    if bp != batch or obs_pad != obs:
        x = jnp.pad(x, ((0, bp - batch), (0, obs_pad - obs)))

    def full(arr):                         # weights resident across the batch grid
        return pl.BlockSpec(arr.shape, lambda i: (0, 0))

    args = (x, w1, b1, w2, b2, w3, b3, wh, bh)
    flops = 2 * bp * (obs_pad * l1w + l1w * l2w + l2w * l3w + l3w * pad_width)
    bytes_accessed = (sum(int(a.size) * a.dtype.itemsize for a in args)
                      + bp * pad_width * 2)                 # bf16 output

    kernel = functools.partial(bdqn_kernel, relu_bf16=_supports_bf16_vpu())
    out = pl.pallas_call(
        kernel,
        out_shape=jax.ShapeDtypeStruct((bp, pad_width), jnp.bfloat16),
        grid_spec=pltpu.PrefetchScalarGridSpec(
            num_scalar_prefetch=0,
            grid=(nb,),
            in_specs=[pl.BlockSpec((tb, obs_pad), lambda i: (i, 0)),
                      full(w1), full(b1),
                      full(w2), full(b2),
                      full(w3), full(b3),
                      full(wh), full(bh)],
            out_specs=pl.BlockSpec((tb, pad_width), lambda i: (i, 0))),
        compiler_params=pltpu.CompilerParams(
            dimension_semantics=("parallel",)),
        cost_estimate=pl.CostEstimate(flops=flops, transcendentals=0,
                                      bytes_accessed=int(bytes_accessed)),
    )(*args)

    # Drop batch/lane padding, expose (B, ac_dim, n) in f32 like PyTorch.
    return out[:batch, :ac_dim * n].astype(jnp.float32).reshape(batch, ac_dim, n)


def reference_forward(x, params):
    """Pure-JAX f32 reference reproducing the PyTorch semantics."""
    (w1, b1, w2, b2, w3, b3, wv, bv, wadv, badv) = params
    h = jnp.maximum(x @ w1 + b1, 0.0)
    h = jnp.maximum(h @ w2 + b2, 0.0)
    h = jnp.maximum(h @ w3 + b3, 0.0)
    value = h @ wv + bv                                   # (B, 1)
    advs = jnp.einsum('bf,afn->ban', h, wadv) + badv.reshape(1, badv.shape[0], -1)
    q = value[:, :, None] + advs - advs.mean(axis=2, keepdims=True)
    return q


if __name__ == "__main__":
    # Module-default hidden widths; batch chosen to exercise ragged padding
    # plus a 2-step batch grid (both TCs on v7x) while staying small.
    batch, obs = 200, 32
    l1w, l2w, l3w = 512, 256, 256
    ac_dim, n = 4, 8

    key = jax.random.PRNGKey(0)
    k_x, k_p = jax.random.split(key)
    x = jax.random.normal(k_x, (batch, obs), jnp.float32)
    params = init_params(k_p, obs, ac_dim, n, l1w, l2w, l3w)
    packed, pad_width = pack_params(params, obs, ac_dim, n)

    q_kernel = branching_q_forward(x, packed, ac_dim, n, pad_width)
    q_kernel = jax.block_until_ready(q_kernel)

    q_ref = reference_forward(x, params)
    assert q_kernel.shape == (batch, ac_dim, n)
    # bf16 MXU inputs + bf16 output -> loosen tolerance vs the f32 reference
    assert jnp.allclose(q_kernel, q_ref, atol=3e-2, rtol=3e-2), "mismatch vs reference"

    print("KERNEL_OK")
</pallas_src>

<mosaic_0001>
module attributes {stable_mosaic.version = 11 : i64} {
  func.func @bdqn_kernel(%arg0: i32, %arg1: memref<128x128xf32, #tpu.memory_space<vmem>>, %arg2: memref<128x512xbf16, #tpu.memory_space<vmem>>, %arg3: memref<1x512xf32, #tpu.memory_space<vmem>>, %arg4: memref<512x256xbf16, #tpu.memory_space<vmem>>, %arg5: memref<1x256xf32, #tpu.memory_space<vmem>>, %arg6: memref<256x256xbf16, #tpu.memory_space<vmem>>, %arg7: memref<1x256xf32, #tpu.memory_space<vmem>>, %arg8: memref<256x128xbf16, #tpu.memory_space<vmem>>, %arg9: memref<1x128xf32, #tpu.memory_space<vmem>>, %arg10: memref<128x128xbf16, #tpu.memory_space<vmem>>) attributes {dimension_semantics = [#tpu.dimension_semantics<parallel>], iteration_bounds = array<i64: 2>, scalar_prefetch = 0 : i64, scratch_operands = 0 : i64, tpu.core_type = #tpu.core_type<tc>, window_params = [{transform_indices = @transform_0, window_bounds = array<i64: 128, 128>}, {pipeline_mode = #tpu.pipeline_mode<synchronous>, transform_indices = @transform_1, window_bounds = array<i64: 128, 512>}, {pipeline_mode = #tpu.pipeline_mode<synchronous>, transform_indices = @transform_2, window_bounds = array<i64: 1, 512>}, {pipeline_mode = #tpu.pipeline_mode<synchronous>, transform_indices = @transform_3, window_bounds = array<i64: 512, 256>}, {pipeline_mode = #tpu.pipeline_mode<synchronous>, transform_indices = @transform_4, window_bounds = array<i64: 1, 256>}, {pipeline_mode = #tpu.pipeline_mode<synchronous>, transform_indices = @transform_5, window_bounds = array<i64: 256, 256>}, {pipeline_mode = #tpu.pipeline_mode<synchronous>, transform_indices = @transform_6, window_bounds = array<i64: 1, 256>}, {pipeline_mode = #tpu.pipeline_mode<synchronous>, transform_indices = @transform_7, window_bounds = array<i64: 256, 128>}, {pipeline_mode = #tpu.pipeline_mode<synchronous>, transform_indices = @transform_8, window_bounds = array<i64: 1, 128>}, {transform_indices = @transform_9, window_bounds = array<i64: 128, 128>}]} {
    %c0 = arith.constant 0 : index
    %c0_0 = arith.constant 0 : index
    %0 = vector.load %arg1[%c0, %c0_0] : memref<128x128xf32, #tpu.memory_space<vmem>>, vector<128x128xf32>
    %1 = arith.truncf %0 : vector<128x128xf32> to vector<128x128xbf16>
    %c0_1 = arith.constant 0 : index
    %c0_2 = arith.constant 0 : index
    %2 = vector.load %arg2[%c0_1, %c0_2] : memref<128x512xbf16, #tpu.memory_space<vmem>>, vector<128x512xbf16>
    %cst = arith.constant dense<0.000000e+00> : vector<128x512xf32>
    %3 = tpu.matmul %1, %2, %cst {dimension_numbers = #tpu.dot_dimension_numbers<[1], [0], [0], [1], [0, 0, 1, 1], [], []>} : vector<128x128xbf16>, vector<128x512xbf16>, vector<128x512xf32> -> vector<128x512xf32>
    %c0_3 = arith.constant 0 : index
    %c0_4 = arith.constant 0 : index
    %4 = vector.load %arg3[%c0_3, %c0_4] : memref<1x512xf32, #tpu.memory_space<vmem>>, vector<1x512xf32>
    %5 = vector.broadcast %4 : vector<1x512xf32> to vector<128x512xf32>
    %6 = arith.addf %3, %5 : vector<128x512xf32>
    %7 = arith.truncf %6 : vector<128x512xf32> to vector<128x512xbf16>
    %cst_5 = arith.constant 0.000000e+00 : bf16
    %8 = vector.broadcast %cst_5 : bf16 to vector<128x512xbf16>
    %9 = arith.maximumf %7, %8 : vector<128x512xbf16>
    %c0_6 = arith.constant 0 : index
    %c0_7 = arith.constant 0 : index
    %10 = vector.load %arg4[%c0_6, %c0_7] : memref<512x256xbf16, #tpu.memory_space<vmem>>, vector<512x256xbf16>
    %cst_8 = arith.constant dense<0.000000e+00> : vector<128x256xf32>
    %11 = tpu.matmul %9, %10, %cst_8 {dimension_numbers = #tpu.dot_dimension_numbers<[1], [0], [0], [1], [0, 0, 1, 1], [], []>} : vector<128x512xbf16>, vector<512x256xbf16>, vector<128x256xf32> -> vector<128x256xf32>
    %c0_9 = arith.constant 0 : index
    %c0_10 = arith.constant 0 : index
    %12 = vector.load %arg5[%c0_9, %c0_10] : memref<1x256xf32, #tpu.memory_space<vmem>>, vector<1x256xf32>
    %13 = vector.broadcast %12 : vector<1x256xf32> to vector<128x256xf32>
    %14 = arith.addf %11, %13 : vector<128x256xf32>
    %15 = arith.truncf %14 : vector<128x256xf32> to vector<128x256xbf16>
    %cst_11 = arith.constant 0.000000e+00 : bf16
    %16 = vector.broadcast %cst_11 : bf16 to vector<128x256xbf16>
    %17 = arith.maximumf %15, %16 : vector<128x256xbf16>
    %c0_12 = arith.constant 0 : index
    %c0_13 = arith.constant 0 : index
    %18 = vector.load %arg6[%c0_12, %c0_13] : memref<256x256xbf16, #tpu.memory_space<vmem>>, vector<256x256xbf16>
    %cst_14 = arith.constant dense<0.000000e+00> : vector<128x256xf32>
    %19 = tpu.matmul %17, %18, %cst_14 {dimension_numbers = #tpu.dot_dimension_numbers<[1], [0], [0], [1], [0, 0, 1, 1], [], []>} : vector<128x256xbf16>, vector<256x256xbf16>, vector<128x256xf32> -> vector<128x256xf32>
    %c0_15 = arith.constant 0 : index
    %c0_16 = arith.constant 0 : index
    %20 = vector.load %arg7[%c0_15, %c0_16] : memref<1x256xf32, #tpu.memory_space<vmem>>, vector<1x256xf32>
    %21 = vector.broadcast %20 : vector<1x256xf32> to vector<128x256xf32>
    %22 = arith.addf %19, %21 : vector<128x256xf32>
    %23 = arith.truncf %22 : vector<128x256xf32> to vector<128x256xbf16>
    %cst_17 = arith.constant 0.000000e+00 : bf16
    %24 = vector.broadcast %cst_17 : bf16 to vector<128x256xbf16>
    %25 = arith.maximumf %23, %24 : vector<128x256xbf16>
    %c0_18 = arith.constant 0 : index
    %c0_19 = arith.constant 0 : index
    %26 = vector.load %arg8[%c0_18, %c0_19] : memref<256x128xbf16, #tpu.memory_space<vmem>>, vector<256x128xbf16>
    %cst_20 = arith.constant dense<0.000000e+00> : vector<128x128xf32>
    %27 = tpu.matmul %25, %26, %cst_20 {dimension_numbers = #tpu.dot_dimension_numbers<[1], [0], [0], [1], [0, 0, 1, 1], [], []>} : vector<128x256xbf16>, vector<256x128xbf16>, vector<128x128xf32> -> vector<128x128xf32>
    %c0_21 = arith.constant 0 : index
    %c0_22 = arith.constant 0 : index
    %28 = vector.load %arg9[%c0_21, %c0_22] : memref<1x128xf32, #tpu.memory_space<vmem>>, vector<1x128xf32>
    %29 = vector.broadcast %28 : vector<1x128xf32> to vector<128x128xf32>
    %30 = arith.addf %27, %29 : vector<128x128xf32>
    %31 = arith.truncf %30 : vector<128x128xf32> to vector<128x128xbf16>
    %c0_23 = arith.constant 0 : index
    %c0_24 = arith.constant 0 : index
    %32 = vector.load %arg10[%c0_23, %c0_24] : memref<128x128xbf16, #tpu.memory_space<vmem>>, vector<128x128xbf16>
    tpu.vector_store %arg10[%c0_23, %c0_24], %31 {strides = array<i32>} : memref<128x128xbf16, #tpu.memory_space<vmem>>, vector<128x128xbf16>,
    return
  }
  func.func @transform_0(%arg0: i32) -> (i32, i32) {
    %c0_i32 = arith.constant 0 : i32
    %c0_i32_0 = arith.constant 0 : i32
    return %arg0, %c0_i32 : i32, i32
  }
  func.func @transform_1(%arg0: i32) -> (i32, i32) {
    %c0_i32 = arith.constant 0 : i32
    %c0_i32_0 = arith.constant 0 : i32
    %c0_i32_1 = arith.constant 0 : i32
    return %c0_i32, %c0_i32_0 : i32, i32
  }
  func.func @transform_2(%arg0: i32) -> (i32, i32) {
    %c0_i32 = arith.constant 0 : i32
    %c0_i32_0 = arith.constant 0 : i32
    %c0_i32_1 = arith.constant 0 : i32
    return %c0_i32, %c0_i32_0 : i32, i32
  }
  func.func @transform_3(%arg0: i32) -> (i32, i32) {
    %c0_i32 = arith.constant 0 : i32
    %c0_i32_0 = arith.constant 0 : i32
    %c0_i32_1 = arith.constant 0 : i32
    return %c0_i32, %c0_i32_0 : i32, i32
  }
  func.func @transform_4(%arg0: i32) -> (i32, i32) {
    %c0_i32 = arith.constant 0 : i32
    %c0_i32_0 = arith.constant 0 : i32
    %c0_i32_1 = arith.constant 0 : i32
    return %c0_i32, %c0_i32_0 : i32, i32
  }
  func.func @transform_5(%arg0: i32) -> (i32, i32) {
    %c0_i32 = arith.constant 0 : i32
    %c0_i32_0 = arith.constant 0 : i32
    %c0_i32_1 = arith.constant 0 : i32
    return %c0_i32, %c0_i32_0 : i32, i32
  }
  func.func @transform_6(%arg0: i32) -> (i32, i32) {
    %c0_i32 = arith.constant 0 : i32
    %c0_i32_0 = arith.constant 0 : i32
    %c0_i32_1 = arith.constant 0 : i32
    return %c0_i32, %c0_i32_0 : i32, i32
  }
  func.func @transform_7(%arg0: i32) -> (i32, i32) {
    %c0_i32 = arith.constant 0 : i32
    %c0_i32_0 = arith.constant 0 : i32
    %c0_i32_1 = arith.constant 0 : i32
    return %c0_i32, %c0_i32_0 : i32, i32
  }
  func.func @transform_8(%arg0: i32) -> (i32, i32) {
    %c0_i32 = arith.constant 0 : i32
    %c0_i32_0 = arith.constant 0 : i32
    %c0_i32_1 = arith.constant 0 : i32
    return %c0_i32, %c0_i32_0 : i32, i32
  }
  func.func @transform_9(%arg0: i32) -> (i32, i32) {
    %c0_i32 = arith.constant 0 : i32
    %c0_i32_0 = arith.constant 0 : i32
    return %arg0, %c0_i32 : i32, i32
  }
}

</mosaic_0001>

<bundles_post_ra>
// kernel: tpu_custom_call.1
= control target key start
LH: loop header
LB: loop body
LE: loop exit
PB: predicated region body
PF: predicated region fallthrough
CT: control target
= control target key end

     0   :  { %s4011_s0 = inlined_call_operand.hbm [shape: f32[256,128], index: 0, kind: input, shape index: {}]   ;;  %s4012_s1 = inlined_call_operand.hbm [shape: bf16[128,512], index: 1, kind: input, shape index: {}]   ;;  %s4013_s2 = inlined_call_operand.vmem [shape: f32[1,512], index: 2, kind: input, shape index: {}]   ;;  %s4014_s3 = inlined_call_operand.hbm [shape: bf16[512,256], index: 3, kind: input, shape index: {}]   ;;  %s4015_s4 = inlined_call_operand.vmem [shape: f32[1,256], index: 4, kind: input, shape index: {}]   ;;  %s4016_s5 = inlined_call_operand.hbm [shape: bf16[256,256], index: 5, kind: input, shape index: {}]   ;;  %s4017_s6 = inlined_call_operand.vmem [shape: f32[1,256], index: 6, kind: input, shape index: {}]   ;;  %s4018_s7 = inlined_call_operand.hbm [shape: bf16[256,128], index: 7, kind: input, shape index: {}]   ;;  %s4019_s8 = inlined_call_operand.vmem [shape: f32[1,128], index: 8, kind: input, shape index: {}]   ;;  %s4020_s9 = inlined_call_operand.hbm [shape: bf16[256,128], index: 9, kind: output, shape index: {}]  }
   0x1   :  { %4027 = sst [smem:[#allocation18_spill]] %s4019_s8 }
   0x2   :  { %4028 = sst [smem:[#allocation19_spill]] %s4020_s9 }
   0x3   :  { %14 = vsyncpa [#allocation3], 0 }
   0x4   :  { %16 = vsyncpa [#allocation3 + $0x1], 0 }
   0x5   :  { %17 = vsyncpa [#allocation6], 0 }
   0x6   :  { %18 = vsyncpa [#allocation9], 0 }
   0x7   :  { %19 = vsyncpa [#allocation4], 0 }
   0x8   :  { %21 = vsyncpa [#allocation4 + $0x1], 0  ;;  %s3343_s30 = smov 0   ;;  %s3345_s10 = smov 0  }
   0x9   :  { %s3347_s11 = smov 0   ;;  %s3349_s12 = smov 0  }
   0xa LB: > { %4029 = sst [smem:[#allocation16_spill]] %s3264_s30  ;;  %s3364_s13 = sadd.s32 4294967295, %s3276_s12   ;;  %s3276_s12 = sphi %s3349_s12, %s4054_s12   ;;  %s3272_s11 = sphi %s3347_s11, %s4053_s11   ;;  %s3268_s10 = sphi %s3345_s10, %s4052_s10   ;;  %s3264_s30 = sphi %s3343_s30, %s4051_s30  }
   0xb   : > { %s2380_s14 = sadd.s32 4294967294, %s3276_s12   ;;  %p47_p0 = scmp.ne.s32.totalorder %s3268_s10, %s3264_s30 }
   0xc   : > { %p4021_p1 = scmp.eq.s32.totalorder %s3364_s13, 0  ;;  %p245_p3 = scmp.eq.s32.totalorder %s2380_s14, 1 }
   0xd   : > { %p2381_p5 = scmp.ge.s32.totalorder %s3276_s12, 1  ;;  %p252_p7 = scmp.lt.s32.totalorder %s3276_s12, 3 }
   0xe   : > { %p3373_p4 = por %p4021_p1, %p47_p0  ;;  %p3378_p6 = por %p245_p3, %p47_p0 }
   0xf   : > { %p3383_p8 = pnand %p2381_p5, %p252_p7  ;;  %s3278_s18 = smov [#allocation5]  }
  0x10   : > { %s4030_s15 = scalar_select %p3373_p4, 1, 0 }
  0x11   : > { %s4031_s16 = scalar_select %p3378_p6, 1, 0 }
  0x12   : > { %s4033_s17 = scalar_select %p3383_p8, 1, 0 }
  0x13   : > { %4032 = sst [smem:[#allocation17_spill]] %s4031_s16  ;;  %s264_s19 = sshll.u32 %s3278_s18, 4  ;;  %s265_s19 = int_to_ptr.vmem [resolvable:$true] %s264_s19 }
  0x14   : > { %p2776_p9 = pneg %p3383_p8  ;;  %s3279_s21 = smov [#allocation8]  }
  0x15   : > { %s296_s22 = sshll.u32 %s3279_s21, 4  ;;  %s3060_s25 = scalar_lea.hbm %s4012_s1, 4096  ;;  %s297_s22 = int_to_ptr.vmem [resolvable:$true] %s296_s22 }
  0x16   : > { %p3392_p11 = pnand %p2776_p9, %p4021_p1  ;;  %p3061_p12 = scmp.ne.s32.totalorder %s4012_s1, %s3060_s25 }
  0x17   : > { %p3067_p5 = scmp.lt.u32.totalorder %s3060_s25, %s4012_s1 }
  0x18   : > { %p3404_p13 = pneg %p3392_p11 }
  0x1a   : > { %p3063_p0 = pnand %p3404_p13, %p3061_p12 }
  0x1c   : > { %p3064_p3 = pneg %p3063_p0 }
  0x1e   : > { %p3069_p7 = pnand %p3067_p5, %p3064_p3 }
  0x20   : > { %3072 = shalt.err (!%p3069_p7)
}
  0x21   : > { %s3073_s18 = scalar_lea.vmem %s265_s19, 4096  ;;  %p3081_p2 = scmp.lt.s32.totalorder %s265_s19, %s265_s19 }
  0x22   : > { %p3074_p9 = scmp.ne.s32.totalorder %s265_s19, %s3073_s18  ;;  %p3082_p6 = scmp.lt.s32.totalorder %s3073_s18, %s3073_s18 }
  0x24   : > { %p3076_p10 = pnand %p3074_p9, %p3404_p13  ;;  %p3083_p4 = por %p3082_p6, %p3081_p2 }
  0x26   : > { %p3077_p1 = pneg %p3076_p10 }
  0x28   : > { %p3084_p8 = pnand %p3083_p4, %p3077_p1 }
  0x2a   : > { %3087 = shalt.err (!%p3084_p8)
}
  0x2b   : > { %s3280_s21 = smov 256   ;;  %s3281_s23 = smov 16  }
  0x2c   : > { %2779 = dma.hbm_to_vmem [thread:$0]  (!%p3392_p11), %s4012_s1, 4096, %s265_s19, [#allocation6], %s3280_s21, %s3280_s21, %s3281_s23  }
  0x2d   : > { %s3282_s26 = smov [#allocation7]   ;;  %s3088_s16 = scalar_lea.hbm %s4016_s5, 4096 }
  0x2e   : > { %s280_s27 = sshll.u32 %s3282_s26, 4  ;;  %p3089_p1 = scmp.ne.s32.totalorder %s4016_s5, %s3088_s16  ;;  %s281_s27 = int_to_ptr.vmem [resolvable:$true] %s280_s27 }
  0x2f   : > { %p3095_p6 = scmp.lt.u32.totalorder %s3088_s16, %s4016_s5 }
  0x30   : > { %p3091_p2 = pnand %p3089_p1, %p3404_p13 }
  0x32   : > { %p3092_p4 = pneg %p3091_p2 }
  0x34   : > { %p3097_p8 = pnand %p3095_p6, %p3092_p4 }
  0x36   : > { %3100 = shalt.err (!%p3097_p8)
}
  0x37   : > { %s3101_s19 = scalar_lea.vmem %s297_s22, 4096  ;;  %p3109_p3 = scmp.lt.s32.totalorder %s297_s22, %s297_s22 }
  0x38   : > { %p3102_p10 = scmp.ne.s32.totalorder %s297_s22, %s3101_s19  ;;  %p3110_p5 = scmp.lt.s32.totalorder %s3101_s19, %s3101_s19 }
  0x3a   : > { %p3104_p12 = pnand %p3102_p10, %p3404_p13  ;;  %p3111_p7 = por %p3110_p5, %p3109_p3 }
  0x3c   : > { %p3105_p0 = pneg %p3104_p12 }
  0x3e   : > { %p3112_p9 = pnand %p3111_p7, %p3105_p0 }
  0x40   : > { %3115 = shalt.err (!%p3112_p9)
}
  0x41   : > { %s3283_s30 = smov 128   ;;  %s3284_s21 = smov 8  }
  0x42   : > { %2785 = dma.hbm_to_vmem [thread:$0]  (!%p3392_p11), %s4016_s5, 4096, %s297_s22, [#allocation9], %s3283_s30, %s3283_s30, %s3284_s21  }
  0x43   : > { %s3116_s24 = scalar_lea.hbm %s4014_s3, 8192 }
  0x44   : > { %p3117_p1 = scmp.ne.s32.totalorder %s4014_s3, %s3116_s24  ;;  %p3123_p6 = scmp.lt.u32.totalorder %s3116_s24, %s4014_s3 }
  0x46   : > { %p3119_p2 = pnand %p3117_p1, %p3404_p13 }
  0x48   : > { %p3120_p4 = pneg %p3119_p2 }
  0x4a   : > { %p3125_p8 = pnand %p3123_p6, %p3120_p4 }
  0x4c   : > { %3128 = shalt.err (!%p3125_p8)
}
  0x4d   : > { %s3129_s18 = scalar_lea.vmem %s281_s27, 8192  ;;  %p3137_p3 = scmp.lt.s32.totalorder %s281_s27, %s281_s27 }
  0x4e   : > { %p3130_p10 = scmp.ne.s32.totalorder %s281_s27, %s3129_s18  ;;  %p3138_p5 = scmp.lt.s32.totalorder %s3129_s18, %s3129_s18 }
  0x50   : > { %p3132_p12 = pnand %p3130_p10, %p3404_p13  ;;  %p3139_p7 = por %p3138_p5, %p3137_p3 }
  0x52   : > { %p3133_p0 = pneg %p3132_p12 }
  0x54   : > { %p3140_p9 = pnand %p3139_p7, %p3133_p0 }
  0x56   : > { %3143 = shalt.err (!%p3140_p9)
}
  0x57   : > { %2782 = dma.hbm_to_vmem [thread:$0]  (!%p3392_p11), %s4014_s3, 8192, %s281_s27, [#allocation6], %s3283_s30, %s3283_s30, %s3284_s21  }
  0x58   : > { %s3285_s8 = smov [#allocation10]   ;;  %s3144_s24 = scalar_lea.hbm %s4018_s7, 2048 }
  0x59   : > { %s312_s9 = sshll.u32 %s3285_s8, 4  ;;  %p3145_p1 = scmp.ne.s32.totalorder %s4018_s7, %s3144_s24  ;;  %s313_s9 = int_to_ptr.vmem [resolvable:$true] %s312_s9 }
  0x5a   : > { %p3151_p6 = scmp.lt.u32.totalorder %s3144_s24, %s4018_s7 }
  0x5b   : > { %p3147_p2 = pnand %p3145_p1, %p3404_p13 }
  0x5d   : > { %p3148_p4 = pneg %p3147_p2 }
  0x5f   : > { %p3153_p8 = pnand %p3151_p6, %p3148_p4 }
  0x61   : > { %3156 = shalt.err (!%p3153_p8)
}
  0x62   : > { %s3157_s27 = scalar_lea.vmem %s313_s9, 2048  ;;  %p3165_p3 = scmp.lt.s32.totalorder %s313_s9, %s313_s9 }
  0x63   : > { %p3158_p10 = scmp.ne.s32.totalorder %s313_s9, %s3157_s27  ;;  %p3166_p5 = scmp.lt.s32.totalorder %s3157_s27, %s3157_s27 }
  0x65   : > { %p3160_p12 = pnand %p3158_p10, %p3404_p13  ;;  %p3167_p7 = por %p3166_p5, %p3165_p3 }
  0x67   : > { %p3161_p0 = pneg %p3160_p12 }
  0x69   : > { %p3168_p9 = pnand %p3167_p7, %p3161_p0 }
  0x6b   : > { %3171 = shalt.err (!%p3168_p9)
}
  0x6c   : > { %s3286_s18 = smov 64   ;;  %s3287_s28 = smov 4  }
  0x6d   : > { %2788 = dma.hbm_to_vmem [thread:$0]  (!%p3392_p11), %s4018_s7, 2048, %s313_s9, [#allocation9], %s3286_s18, %s3286_s18, %s3287_s28  }
  0x6e   : > { %s3481_s8 = sadd.s32 1, %s3276_s12   ;;  %s34_s23 = sadd.s32 1, %s3272_s11 }
  0x6f   : > { %s31_s16 = ssub.s32 %s3276_s12, %s3481_s8  ;;  %p41_p1 = scmp.ne.s32.totalorder %s3272_s11, %s3268_s10 }
  0x70   : > { %p32_p13 = scmp.eq.s32.totalorder %s31_s16, 0  ;;  %p42_p2 = scmp.eq.s32.totalorder %s3276_s12, 0 }
  0x71   : > { %p4036_p6 = scmp.eq.s32.totalorder %s3364_s13, 1  ;;  %p2801_p10 = scmp.lt.s32.totalorder %s3276_s12, 2 }
  0x72   : > { %s3490_s24 = scalar_select %p32_p13, %s3272_s11, %s34_s23  }
  0x73   : > { %p43_p4 = por %p42_p2, %p41_p1  ;;  %p3494_p8 = por %p4036_p6, %p41_p1 }
  0x74   : > { %s329_s20 = sand.u32 1, %s3272_s11   ;;  %s2563_s9 = sshll.u32 %s3276_s12, 11 }
  0x75   : > { %s2387_s26 = sshll.u32 %s329_s20, 7  ;;  %s3504_s27 = scalar_lea.hbm %s4011_s0, %s2563_s9 }
  0x76   : > { %s333_s18 = scalar_lea.vmem [#allocation2], %s2387_s26  ;;  %p3508_p11 = pnand %p2801_p10, %p43_p4 }
  0x77   : > { %s340_s28 = sshll.u32 %s333_s18, 4  ;;  %s3512_s19 = scalar_lea.sflag [#allocation3], %s329_s20  ;;  %s3506_s28 = int_to_ptr.vmem [resolvable:$true] %s340_s28 }
  0x78   : > { %s3172_s16 = scalar_lea.hbm %s3504_s27, 2048  ;;  %p3174_p0 = pneg %p3508_p11 }
  0x79   : > { %p3173_p12 = scmp.ne.s32.totalorder %s3504_s27, %s3172_s16  ;;  %s3177_s9 = scalar_lea.hbm %s4011_s0, 4096 }
  0x7a   : > { %p3178_p7 = scmp.lt.u32.totalorder %s3504_s27, %s4011_s0  ;;  %p3179_p9 = scmp.lt.u32.totalorder %s3177_s9, %s3172_s16 }
  0x7b   : > { %p3175_p3 = pnand %p3174_p0, %p3173_p12  ;;  %p3181_p1 = scmp.lt.u32.totalorder %s3172_s16, %s3504_s27 }
  0x7c   : > { %p3180_p13 = por %p3179_p9, %p3178_p7 }
  0x7d   : > { %p3176_p5 = pneg %p3175_p3 }
  0x7e   : > { %p3182_p2 = por %p3181_p1, %p3180_p13 }
  0x80   : > { %p3183_p4 = pnand %p3182_p2, %p3176_p5 }
  0x82   : > { %3186 = shalt.err (!%p3183_p4)
}
  0x83   : > { %s3187_s20 = scalar_lea.vmem %s3506_s28, 2048  ;;  %s3288_s18 = smov [#allocation2]  }
  0x84   : > { %p3188_p6 = scmp.ne.s32.totalorder %s3506_s28, %s3187_s20  ;;  %s3192_s23 = sshll.u32 %s3288_s18, 4  ;;  %s3193_s23 = int_to_ptr.vmem [resolvable:$false] %s3192_s23 }
  0x85   : > { %s3194_s26 = scalar_lea.vmem %s3193_s23, 4096  ;;  %p3195_p3 = scmp.lt.s32.totalorder %s3506_s28, %s3193_s23 }
  0x86   : > { %p3190_p10 = pnand %p3188_p6, %p3174_p0  ;;  %p3196_p7 = scmp.lt.s32.totalorder %s3194_s26, %s3187_s20 }
  0x88   : > { %p3191_p12 = pneg %p3190_p10  ;;  %p3197_p9 = por %p3196_p7, %p3195_p3 }
  0x8a   : > { %p3198_p13 = pnand %p3197_p9, %p3191_p12 }
  0x8c   : > { %3201 = shalt.err (!%p3198_p13)
}
  0x8d   : > { %2792 = dma.hbm_to_vmem [thread:$0]  (!%p3508_p11), %s3504_s27, 2048, %s3506_s28, %s3512_s19, %s3283_s30, %s3283_s30, %s3284_s21  }
  0x8e   : > { %p4039_p0 = scmp.ne.s32.totalorder %s4033_s17, 0 }
  0x8f   : > { %s3546_s16 = sand.u32 (!%p4039_p0), 1, %s3268_s10   ;;  %p4040_p5 = scmp.ne.s32.totalorder (!%p4039_p0), %s4030_s15, 0 }
  0x90   : > { %352 = sbr.rel (%p4039_p0) target bundleno = 1215 (0x4bf), region = 56  ;;  %s2391_s9 = sshll.u32 (!%p4039_p0), %s3546_s16, 7 }
  0x91   : > { %s355_s29 = scalar_lea.sflag (!%p4039_p0), [#allocation3], %s3546_s16  ;;  %s3550_s14 = scalar_lea.vmem (!%p4039_p0), [#allocation2], %s2391_s9 }
  0x97   : > { %3247 = dma.done.wait (%p4040_p5), %s355_s29, 2048  }
  0x98   : > { %3249 = vsyncadd (%p4040_p5), %s355_s29, 4294965248  ;;  %p4041_p11 = scmp.eq.s32.totalorder %s3364_s13, 0 }
  0x9a   : > { %3251 = dma.done.wait (%p4041_p11), [#allocation6], 12288   ;;  %p4042_p1 = pmov %p4041_p11 }
  0x9c   : > { %3253 = vsyncadd (%p4042_p1), [#allocation6], 4294955008  ;;  %p4043_p2 = pmov %p4042_p1 }
  0x9d   : > { %p4044_p4 = pmov %p4042_p1 }
  0x9e   : > { %3255 = dma.done.wait (%p4043_p2), [#allocation9], 6144  }
  0x9f   : > { %3257 = vsyncadd (%p4044_p4), [#allocation9], 4294961152  ;;  %v3289_v0 = vmov 0   ;;  %v2852_v1 = vld [vmem:[#allocation5 + $0x4] ss:$16 sps:$4 sm:$0xff]   ;;  %v413_v27 = vld [vmem:[%s3550_s14 + $0x8] sm:$0xff] }
  0xa0   : > { %682 = vmatprep.mubr.bf16.mxu0 %v3289_v0  ;;  %795 = vmatprep.mubr.bf16.mxu1 %v3289_v0  ;;  %v2854_v2 = vld [vmem:[#allocation5] ss:$16 sps:$4 sm:$0xff]   ;;  %v2855_v3 = vld [vmem:[#allocation5 + $0x24] ss:$16 sps:$4 sm:$0xff]   ;;  %v2876_v10 = vld [vmem:[#allocation5 + $0xc] ss:$16 sps:$4 sm:$0xff]  }
  0xa1   : > { %650 = vmatprep.subr.bf16.mxu0 %v2852_v1  ;;  %v2857_v4 = vld [vmem:[#allocation5 + $0x20] ss:$16 sps:$4 sm:$0xff]   ;;  %v2858_v5 = vld [vmem:[#allocation5 + $0x44] ss:$16 sps:$4 sm:$0xff]   ;;  %v2878_v11 = vld [vmem:[#allocation5 + $0x8] ss:$16 sps:$4 sm:$0xff]   ;;  %763 = vmatprep.subr.bf16.mxu1 %v2876_v10 }
  0xa2   : > { %651 = vmatpush1.bf16.msra.mxu0 %v2854_v2  ;;  %v2860_v6 = vld [vmem:[#allocation5 + $0x40] ss:$16 sps:$4 sm:$0xff]   ;;  %v2861_v7 = vld [vmem:[#allocation5 + $0x64] ss:$16 sps:$4 sm:$0xff]   ;;  %v2879_v14 = vld [vmem:[#allocation5 + $0x2c] ss:$16 sps:$4 sm:$0xff]   ;;  %764 = vmatpush1.bf16.msra.mxu1 %v2878_v11 }
  0xa3   : > { %652 = vmatprep.subr.bf16.mxu0 %v2855_v3  ;;  %v2863_v8 = vld [vmem:[#allocation5 + $0x60] ss:$16 sps:$4 sm:$0xff]   ;;  %v2864_v9 = vld [vmem:[#allocation5 + $0x84] ss:$16 sps:$4 sm:$0xff]   ;;  %v2881_v15 = vld [vmem:[#allocation5 + $0x28] ss:$16 sps:$4 sm:$0xff]   ;;  %765 = vmatprep.subr.bf16.mxu1 %v2879_v14 }
  0xa4   : > { %v2866_v12 = vld [vmem:[#allocation5 + $0x80] ss:$16 sps:$4 sm:$0xff]   ;;  %v2867_v13 = vld [vmem:[#allocation5 + $0xa4] ss:$16 sps:$4 sm:$0xff]   ;;  %v2882_v16 = vld [vmem:[#allocation5 + $0x4c] ss:$16 sps:$4 sm:$0xff]  }
  0xa5   : > { %v2869_v17 = vld [vmem:[#allocation5 + $0xa0] ss:$16 sps:$4 sm:$0xff]   ;;  %v2870_v18 = vld [vmem:[#allocation5 + $0xc4] ss:$16 sps:$4 sm:$0xff]   ;;  %v2884_v19 = vld [vmem:[#allocation5 + $0x48] ss:$16 sps:$4 sm:$0xff]  }
  0xa6   : > { %653 = vmatpush1.bf16.msra.mxu0 %v2857_v4  ;;  %766 = vmatpush1.bf16.msra.mxu1 %v2881_v15  ;;  %v2885_v20 = vld [vmem:[#allocation5 + $0x6c] ss:$16 sps:$4 sm:$0xff]   ;;  %v2872_v21 = vld [vmem:[#allocation5 + $0xc0] ss:$16 sps:$4 sm:$0xff]   ;;  %v2873_v22 = vld [vmem:[#allocation5 + $0xe4] ss:$16 sps:$4 sm:$0xff]  }
  0xa7   : > { %654 = vmatprep.subr.bf16.mxu0 %v2858_v5  ;;  %767 = vmatprep.subr.bf16.mxu1 %v2882_v16  ;;  %v2887_v23 = vld [vmem:[#allocation5 + $0x68] ss:$16 sps:$4 sm:$0xff]   ;;  %v2875_v24 = vld [vmem:[#allocation5 + $0xe0] ss:$16 sps:$4 sm:$0xff]   ;;  %v2888_v25 = vld [vmem:[#allocation5 + $0x8c] ss:$16 sps:$4 sm:$0xff]  }
  0xa8   : > { %v412_v26 = vld [vmem:[%s3550_s14] sm:$0xff]  ;;  %v2890_v29 = vld [vmem:[#allocation5 + $0x88] ss:$16 sps:$4 sm:$0xff]   ;;  %v2891_v31 = vld [vmem:[#allocation5 + $0xac] ss:$16 sps:$4 sm:$0xff]   ;;  %s4045_s20 = sld [smem:[#allocation18_spill]] }
  0xa9   : > { %v2902_v28 = vld [vmem:[#allocation7 + $0x4] ss:$8 sps:$4 sm:$0xff]   ;;  %v428_v30 = vpack.c.bf16 %v413_v27, %v412_v26  ;;  %v2900_v32 = vld [vmem:[#allocation7] ss:$8 sps:$4 sm:$0xff]   ;;  %v2905_v33 = vld [vmem:[#allocation7 + $0x14] ss:$8 sps:$4 sm:$0xff]   ;;  %v470_v27 = vlaneseq }
  0xaa   : > { %655 = vmatpush1.bf16.msra.mxu0 %v2860_v6  ;;  %768 = vmatpush1.bf16.msra.mxu1 %v2884_v19  ;;  %v2893_v34 = vld [vmem:[#allocation5 + $0xa8] ss:$16 sps:$4 sm:$0xff]   ;;  %v414_v35 = vld [vmem:[%s3550_s14 + $0x10] sm:$0xff]  ;;  %v2894_v36 = vld [vmem:[#allocation5 + $0xcc] ss:$16 sps:$4 sm:$0xff]   ;;  %s2396_s18 = sshll.u32 %s3546_s16, 6 }
  0xab   : > { %656 = vmatprep.subr.bf16.mxu0 %v2861_v7  ;;  %769 = vmatprep.subr.bf16.mxu1 %v2885_v20  ;;  %v415_v37 = vld [vmem:[%s3550_s14 + $0x18] sm:$0xff]  ;;  %v2908_v39 = vld [vmem:[#allocation7 + $0x24] ss:$8 sps:$4 sm:$0xff]   ;;  %v2906_v43 = vld [vmem:[#allocation7 + $0x20] ss:$8 sps:$4 sm:$0xff]   ;;  %s3936_s23 = scalar_lea.vmem [#allocation11], %s2396_s18 }
  0xac   : > { %v2903_v38 = vld [vmem:[#allocation7 + $0x10] ss:$8 sps:$4 sm:$0xff]   ;;  %v429_v41 = vpack.c.bf16 %v415_v37, %v414_v35  ;;  %v2897_v42 = vld [vmem:[#allocation5 + $0xec] ss:$16 sps:$4 sm:$0xff]   ;;  %v416_v46 = vld [vmem:[%s3550_s14 + $0x20] sm:$0xff]  ;;  %s2580_s26 = sshll.u32 %s3364_s13, 10 }
  0xad   : > { %v2896_v40 = vld [vmem:[#allocation5 + $0xc8] ss:$16 sps:$4 sm:$0xff]   ;;  %v2911_v44 = vld [vmem:[#allocation7 + $0x34] ss:$8 sps:$4 sm:$0xff]   ;;  %v2914_v49 = vld [vmem:[#allocation7 + $0x44] ss:$8 sps:$4 sm:$0xff]  }
  0xae   : > { %657 = vmatpush1.bf16.msra.mxu0 %v2863_v8  ;;  %770 = vmatpush1.bf16.msra.mxu1 %v2887_v23  ;;  %v2899_v45 = vld [vmem:[#allocation5 + $0xe8] ss:$16 sps:$4 sm:$0xff]   ;;  %v2917_v52 = vld [vmem:[#allocation7 + $0x54] ss:$8 sps:$4 sm:$0xff]   ;;  %v2920_v56 = vld [vmem:[#allocation7 + $0x64] ss:$8 sps:$4 sm:$0xff]  }
  0xaf   : > { %658 = vmatprep.subr.bf16.mxu0 %v2864_v9  ;;  %771 = vmatprep.subr.bf16.mxu1 %v2888_v25  ;;  %v417_v47 = vld [vmem:[%s3550_s14 + $0x28] sm:$0xff]  ;;  %v2909_v48 = vld [vmem:[#allocation7 + $0x30] ss:$8 sps:$4 sm:$0xff]   ;;  %v2923_v59 = vld [vmem:[#allocation7 + $0x74] ss:$8 sps:$4 sm:$0xff]   ;;  %s2269_s9 = sshll.u32 %s3936_s23, 4  ;;  %s3966_s9 = int_to_ptr.vmem [resolvable:$true] %s2269_s9 }
  0xb0   : > { %v2912_v50 = vld [vmem:[#allocation7 + $0x40] ss:$8 sps:$4 sm:$0xff]   ;;  %v430_v51 = vpack.c.bf16 %v417_v47, %v416_v46  ;;  %v418_v53 = vld [vmem:[%s3550_s14 + $0x30] sm:$0xff]  ;;  %v419_v54 = vld [vmem:[%s3550_s14 + $0x38] sm:$0xff]  ;;  %s4046_s15 = sld [smem:[#allocation19_spill]]  ;;  %s2256_s30 = scalar_lea.sflag [#allocation4], %s3546_s16 }
  0xb1   : > { %v2915_v55 = vld [vmem:[#allocation7 + $0x50] ss:$8 sps:$4 sm:$0xff]   ;;  %v2918_v57 = vld [vmem:[#allocation7 + $0x60] ss:$8 sps:$4 sm:$0xff]   ;;  %v431_v58 = vpack.c.bf16 %v419_v54, %v418_v53  ;;  %v2926_v63 = vld [vmem:[#allocation7 + $0x84] ss:$8 sps:$4 sm:$0xff]  }
  0xb2   : > { %659 = vmatpush1.bf16.msra.mxu0 %v2866_v12  ;;  %772 = vmatpush1.bf16.msra.mxu1 %v2890_v29  ;;  %v420_v60 = vld [vmem:[%s3550_s14 + $0x40] sm:$0xff]  ;;  %v421_v61 = vld [vmem:[%s3550_s14 + $0x48] sm:$0xff]  ;;  %v2921_v62 = vld [vmem:[#allocation7 + $0x70] ss:$8 sps:$4 sm:$0xff]   ;;  %s3202_s21 = scalar_lea.vmem %s3966_s9, 1024  ;;  %s3290_s13 = smov [#allocation11]  }
  0xb3   : > { %660 = vmatprep.subr.bf16.mxu0 %v2867_v13  ;;  %773 = vmatprep.subr.bf16.mxu1 %v2891_v31  ;;  %v2924_v1 = vld [vmem:[#allocation7 + $0x80] ss:$8 sps:$4 sm:$0xff]   ;;  %v432_v2 = vpack.c.bf16 %v421_v61, %v420_v60  ;;  %v2929_v3 = vld [vmem:[#allocation7 + $0x94] ss:$8 sps:$4 sm:$0xff]   ;;  %v2927_v6 = vld [vmem:[#allocation7 + $0x90] ss:$8 sps:$4 sm:$0xff]   ;;  %p3203_p6 = scmp.ne.s32.totalorder %s3966_s9, %s3202_s21 }
  0xb4   : > { %v422_v4 = vld [vmem:[%s3550_s14 + $0x50] sm:$0xff]  ;;  %v423_v5 = vld [vmem:[%s3550_s14 + $0x58] sm:$0xff]  ;;  %v2932_v7 = vld [vmem:[#allocation7 + $0xa4] ss:$8 sps:$4 sm:$0xff]   ;;  %s3206_s27 = sshll.u32 %s3290_s13, 4  ;;  %s3207_s27 = int_to_ptr.vmem [resolvable:$false] %s3206_s27 }
  0xb5   : > { %v2930_v8 = vld [vmem:[#allocation7 + $0xa0] ss:$8 sps:$4 sm:$0xff]   ;;  %v433_v9 = vpack.c.bf16 %v423_v5, %v422_v4  ;;  %v2935_v10 = vld [vmem:[#allocation7 + $0xb4] ss:$8 sps:$4 sm:$0xff]   ;;  %v2933_v13 = vld [vmem:[#allocation7 + $0xb0] ss:$8 sps:$4 sm:$0xff]   ;;  %p3204_p10 = pnand %p3203_p6, %p3494_p8  ;;  %p3209_p3 = scmp.lt.s32.totalorder %s3966_s9, %s3207_s27 }
  0xb6   : > { %661 = vmatpush1.bf16.msra.mxu0 %v2869_v17  ;;  %774 = vmatpush1.bf16.msra.mxu1 %v2893_v34  ;;  %v424_v11 = vld [vmem:[%s3550_s14 + $0x60] sm:$0xff]  ;;  %v425_v12 = vld [vmem:[%s3550_s14 + $0x68] sm:$0xff]  ;;  %v2941_v17 = vld [vmem:[#allocation7 + $0xd4] ss:$8 sps:$4 sm:$0xff]   ;;  %s3964_s17 = scalar_lea.hbm %s4046_s15, %s2580_s26  ;;  %s3208_s28 = scalar_lea.vmem %s3207_s27, 2048 }
  0xb7   : > { %662 = vmatprep.subr.bf16.mxu0 %v2870_v18  ;;  %775 = vmatprep.subr.bf16.mxu1 %v2894_v36  ;;  %v2938_v14 = vld [vmem:[#allocation7 + $0xc4] ss:$8 sps:$4 sm:$0xff]   ;;  %v434_v15 = vpack.c.bf16 %v425_v12, %v424_v11  ;;  %v2936_v16 = vld [vmem:[#allocation7 + $0xc0] ss:$8 sps:$4 sm:$0xff]   ;;  %v426_v18 = vld [vmem:[%s3550_s14 + $0x70] sm:$0xff]  ;;  %p3205_p12 = pneg %p3204_p10  ;;  %p3210_p7 = scmp.lt.s32.totalorder %s3208_s28, %s3202_s21 }
  0xb8   : > { %v427_v19 = vld [vmem:[%s3550_s14 + $0x78] sm:$0xff]  ;;  %v2942_v23 = vld [vmem:[#allocation7 + $0xe0] ss:$8 sps:$4 sm:$0xff]   ;;  %v2950_v26 = vld [vmem:[#allocation7 + $0x104] ss:$8 sps:$4 sm:$0xff]  }
  0xb9   : > { %v2939_v20 = vld [vmem:[#allocation7 + $0xd0] ss:$8 sps:$4 sm:$0xff]   ;;  %v3010_v12 = vld [vmem:[#allocation8 + $0x44] ss:$8 sps:$4 sm:$0xff]   ;;  %p3211_p9 = por %p3210_p7, %p3209_p3 }
  0xba   : > { %663 = vmatpush1.bf16.msra.mxu0 %v2872_v21  ;;  %776 = vmatpush1.bf16.msra.mxu1 %v2896_v40  ;;  %v435_v21 = vpack.c.bf16 %v427_v19, %v426_v18  ;;  %v2945_v25 = vld [vmem:[#allocation7 + $0xf0] ss:$8 sps:$4 sm:$0xff]   ;;  %v2996_v40 = vld [vmem:[#allocation8] ss:$8 sps:$4 sm:$0xff]  }
  0xbb   : > { %664 = vmatprep.subr.bf16.mxu0 %v2873_v22  ;;  %777 = vmatprep.subr.bf16.mxu1 %v2897_v42  ;;  %v2944_v22 = vld [vmem:[#allocation7 + $0xe4] ss:$8 sps:$4 sm:$0xff]   ;;  %v2999_v47 = vld [vmem:[#allocation8 + $0x10] ss:$8 sps:$4 sm:$0xff]   ;;  %p3212_p13 = pnand %p3211_p9, %p3205_p12 }
  0xbe   : > { %665 = vmatpush1.bf16.msra.mxu0 %v2875_v24  ;;  %778 = vmatpush1.bf16.msra.mxu1 %v2899_v45  ;;  %v2947_v24 = vld [vmem:[#allocation7 + $0xf4] ss:$8 sps:$4 sm:$0xff]  }
  0xbf   : > { %1336 = vmatprep.subr.bf16.mxu0 %v2902_v28  ;;  %v471_v28 = vshrl.u32 %v470_v27, 7 }
  0xc1   : > { %683 = vmatmul.mubr.bf16.vlgmr.msra.gmra.mrb[0].mxu0 %v428_v30  ;;  %796 = vmatmul.mubr.bf16.vlgmr.msra.gmra.mrb[0].mxu1 %v428_v30  ;;  %v3596_v29 = vsub.s32 0, %v471_v28  ;;  %v468_v30 = vld [vmem:[%s4013_s2] sm:$0xf]  ;;  %v3601_v31 = vsub.s32 1, %v471_v28  ;;  %v484_v53 = vsub.s32 3, %v471_v28 }
  0xc2   : > { %692 = vmatprep.mubr.bf16.mxu0 %v3289_v0  ;;  %1337 = vmatpush1.bf16.msra.mxu0 %v2900_v32 }
  0xc3   : > { %1338 = vmatprep.subr.bf16.mxu0 %v2905_v33  ;;  %805 = vmatprep.mubr.bf16.mxu1 %v3289_v0  ;;  %v3604_v32 = vrot.slane %v468_v30, %v3596_v29  ;;  %v3607_v34 = vrot.slane %v468_v30, %v3601_v31  ;;  %v3621_v4 = vrot.slane %v468_v30, %v484_v53 }
  0xc6   : > { %1339 = vmatpush1.bf16.msra.mxu0 %v2903_v38 }
  0xc7   : > { %1340 = vmatprep.subr.bf16.mxu0 %v2908_v39 }
  0xc9   : > { %693 = vmatmul.mubr.bf16.gmra.mrb[4].mxu0 %v429_v41  ;;  %806 = vmatmul.mubr.bf16.gmra.mrb[4].mxu1 %v429_v41  ;;  %v2998_v41 = vld [vmem:[#allocation8 + $0x4] ss:$8 sps:$4 sm:$0xff]  }
  0xca   : > { %702 = vmatprep.mubr.bf16.mxu0 %v3289_v0  ;;  %1341 = vmatpush1.bf16.msra.mxu0 %v2906_v43 }
  0xcb   : > { %1342 = vmatprep.subr.bf16.mxu0 %v2911_v44  ;;  %815 = vmatprep.mubr.bf16.mxu1 %v3289_v0  ;;  %v3001_v44 = vld [vmem:[#allocation8 + $0x14] ss:$8 sps:$4 sm:$0xff]  }
  0xcc   : > { %1798 = vmatprep.subr.bf16.mxu1 %v2998_v41 }
  0xcd   : > { %1799 = vmatpush1.bf16.msra.mxu1 %v2996_v40  ;;  %v2962_v40 = vld [vmem:[#allocation7 + $0x144] ss:$8 sps:$4 sm:$0xff]  }
  0xce   : > { %1343 = vmatpush1.bf16.msra.mxu0 %v2909_v48  ;;  %v480_v48 = vsub.s32 2, %v471_v28  ;;  %1800 = vmatprep.subr.bf16.mxu1 %v3001_v44 }
  0xcf   : > { %1344 = vmatprep.subr.bf16.mxu0 %v2914_v49  ;;  %v3004_v49 = vld [vmem:[#allocation8 + $0x24] ss:$8 sps:$4 sm:$0xff]  }
  0xd1   : > { %703 = vmatmul.mubr.bf16.gmra.mrb[8].mxu0 %v430_v51  ;;  %816 = vmatmul.mubr.bf16.gmra.mrb[8].mxu1 %v430_v51 }
  0xd2   : > { %712 = vmatprep.mubr.bf16.mxu0 %v3289_v0  ;;  %1345 = vmatpush1.bf16.msra.mxu0 %v2912_v50 }
  0xd3   : > { %1346 = vmatprep.subr.bf16.mxu0 %v2917_v52  ;;  %825 = vmatprep.mubr.bf16.mxu1 %v3289_v0  ;;  %v2948_v52 = vld [vmem:[#allocation7 + $0x100] ss:$8 sps:$4 sm:$0xff]  }
  0xd4   : > { %1801 = vmatpush1.bf16.msra.mxu1 %v2999_v47 }
  0xd5   : > { %1802 = vmatprep.subr.bf16.mxu1 %v3004_v49  ;;  %v2960_v49 = vld [vmem:[#allocation7 + $0x140] ss:$8 sps:$4 sm:$0xff]  }
  0xd6   : > { %1347 = vmatpush1.bf16.msra.mxu0 %v2915_v55 }
  0xd7   : > { %1348 = vmatprep.subr.bf16.mxu0 %v2920_v56  ;;  %v2953_v56 = vld [vmem:[#allocation7 + $0x114] ss:$8 sps:$4 sm:$0xff]  }
  0xd9   : > { %713 = vmatmul.mubr.bf16.gmra.mrb[12].mxu0 %v431_v58  ;;  %826 = vmatmul.mubr.bf16.gmra.mrb[12].mxu1 %v431_v58  ;;  %v3002_v58 = vld [vmem:[#allocation8 + $0x20] ss:$8 sps:$4 sm:$0xff]  }
  0xda   : > { %722 = vmatprep.mubr.bf16.mxu0 %v3289_v0  ;;  %1349 = vmatpush1.bf16.msra.mxu0 %v2918_v57 }
  0xdb   : > { %1350 = vmatprep.subr.bf16.mxu0 %v2923_v59  ;;  %835 = vmatprep.mubr.bf16.mxu1 %v3289_v0 }
  0xdc   : > { %1803 = vmatpush1.bf16.msra.mxu1 %v3002_v58 }
  0xde   : > { %1351 = vmatpush1.bf16.msra.mxu0 %v2921_v62  ;;  %v3617_v62 = vrot.slane %v468_v30, %v480_v48 }
  0xdf   : > { %1352 = vmatprep.subr.bf16.mxu0 %v2926_v63  ;;  %v3007_v63 = vld [vmem:[#allocation8 + $0x34] ss:$8 sps:$4 sm:$0xff]  }
  0xe0   : > { %1804 = vmatprep.subr.bf16.mxu1 %v3007_v63 }
  0xe1   : > { %723 = vmatmul.mubr.bf16.gmra.mrb[16].mxu0 %v432_v2  ;;  %836 = vmatmul.mubr.bf16.gmra.mrb[16].mxu1 %v432_v2 }
  0xe2   : > { %732 = vmatprep.mubr.bf16.mxu0 %v3289_v0  ;;  %1353 = vmatpush1.bf16.msra.mxu0 %v2924_v1 }
  0xe3   : > { %1354 = vmatprep.subr.bf16.mxu0 %v2929_v3  ;;  %845 = vmatprep.mubr.bf16.mxu1 %v3289_v0  ;;  %v2951_v3 = vld [vmem:[#allocation7 + $0x110] ss:$8 sps:$4 sm:$0xff]  }
  0xe6   : > { %1355 = vmatpush1.bf16.msra.mxu0 %v2927_v6  ;;  %v2956_v6 = vld [vmem:[#allocation7 + $0x124] ss:$8 sps:$4 sm:$0xff]  }
  0xe7   : > { %1356 = vmatprep.subr.bf16.mxu0 %v2932_v7 }
  0xe9   : > { %733 = vmatmul.mubr.bf16.gmra.mrb[20].mxu0 %v433_v9  ;;  %846 = vmatmul.mubr.bf16.gmra.mrb[20].mxu1 %v433_v9  ;;  %v3005_v9 = vld [vmem:[#allocation8 + $0x30] ss:$8 sps:$4 sm:$0xff]  }
  0xea   : > { %742 = vmatprep.mubr.bf16.mxu0 %v3289_v0  ;;  %1357 = vmatpush1.bf16.msra.mxu0 %v2930_v8 }
  0xeb   : > { %1358 = vmatprep.subr.bf16.mxu0 %v2935_v10  ;;  %855 = vmatprep.mubr.bf16.mxu1 %v3289_v0 }
  0xec   : > { %1805 = vmatpush1.bf16.msra.mxu1 %v3005_v9  ;;  %v2968_v9 = vld [vmem:[#allocation7 + $0x164] ss:$8 sps:$4 sm:$0xff]  }
  0xed   : > { %1806 = vmatprep.subr.bf16.mxu1 %v3010_v12 }
  0xee   : > { %1359 = vmatpush1.bf16.msra.mxu0 %v2933_v13 }
  0xef   : > { %1360 = vmatprep.subr.bf16.mxu0 %v2938_v14 }
  0xf1   : > { %743 = vmatmul.mubr.bf16.gmra.mrb[24].mxu0 %v434_v15  ;;  %856 = vmatmul.mubr.bf16.gmra.mrb[24].mxu1 %v434_v15  ;;  %v2954_v15 = vld [vmem:[#allocation7 + $0x120] ss:$8 sps:$4 sm:$0xff]  }
  0xf2   : > { %752 = vmatprep.mubr.bf16.mxu0 %v3289_v0  ;;  %1361 = vmatpush1.bf16.msra.mxu0 %v2936_v16 }
  0xf3   : > { %1362 = vmatprep.subr.bf16.mxu0 %v2941_v17  ;;  %865 = vmatprep.mubr.bf16.mxu1 %v3289_v0 }
  0xf6   : > { %1363 = vmatpush1.bf16.msra.mxu0 %v2939_v20  ;;  %v2959_v20 = vld [vmem:[#allocation7 + $0x134] ss:$8 sps:$4 sm:$0xff]  }
  0xf7   : > { %1364 = vmatprep.subr.bf16.mxu0 %v2944_v22 }
  0xf9   : > { %753 = vmatmul.mubr.bf16.gmra.mrb[28].mxu0 %v435_v21  ;;  %866 = vmatmul.mubr.bf16.gmra.mrb[28].mxu1 %v435_v21 }
  0xfa   : > { %1365 = vmatpush1.bf16.msra.mxu0 %v2942_v23 }
  0xfb   : > { %1366 = vmatprep.subr.bf16.mxu0 %v2947_v24 }
  0xfe   : > { %1367 = vmatpush1.bf16.msra.mxu0 %v2945_v25  ;;  %v3008_v25 = vld [vmem:[#allocation8 + $0x40] ss:$8 sps:$4 sm:$0xff]  }
  0xff   : > { %1449 = vmatprep.subr.bf16.mxu0 %v2950_v26  ;;  %1807 = vmatpush1.bf16.msra.mxu1 %v3008_v25 }
 0x194   : > { %v684_v33 = vpop.f32.mrb[0].mxu0  ;;  %v797_v8 = vpop.f32.mrb[0].mxu1 }
 0x195   : > { %v686_v35 = vpop.f32.mrb[1].mxu0  ;;  %v685_v37 = vadd.f32 %v684_v33, %v3604_v32  ;;  %v3624_v10 = vadd.f32 %v797_v8, %v3617_v62  ;;  %v799_v11 = vpop.f32.mrb[1].mxu1  ;;  %v3013_v33 = vld [vmem:[#allocation8 + $0x54] ss:$8 sps:$4 sm:$0xff]  }
 0x196   : > { %v688_v36 = vpop.f32.mrb[2].mxu0  ;;  %v687_v42 = vadd.f32 %v686_v35, %v3607_v34  ;;  %v3628_v16 = vadd.f32 %v799_v11, %v3621_v4  ;;  %v801_v17 = vpop.f32.mrb[2].mxu1  ;;  %1808 = vmatprep.subr.bf16.mxu1 %v3013_v33 }
 0x197   : > { %v689_v38 = vadd.f32 %v688_v36, %v3604_v32  ;;  %v690_v39 = vpop.f32.mrb[3].mxu0  ;;  %v3632_v21 = vadd.f32 %v801_v17, %v3617_v62  ;;  %v803_v22 = vpop.f32.mrb[3].mxu1  ;;  %v3022_v17 = vld [vmem:[#allocation8 + $0x84] ss:$8 sps:$4 sm:$0xff]  }
 0x198   : > { %v691_v43 = vadd.f32 %v690_v39, %v3607_v34  ;;  %v3635_v24 = vadd.f32 %v803_v22, %v3621_v4 }
 0x199   : > { %v876_v45 = vpack.c.bf16 %v689_v38, %v685_v37  ;;  %v878_v30 = vpack.c.bf16 %v3632_v21, %v3624_v10  ;;  %v2957_v37 = vld [vmem:[#allocation7 + $0x130] ss:$8 sps:$4 sm:$0xff]  }
 0x19a   : > { %v877_v46 = vpack.c.bf16 %v691_v43, %v687_v42  ;;  %v879_v38 = vpack.c.bf16 %v3635_v24, %v3628_v16  ;;  %v3011_v43 = vld [vmem:[#allocation8 + $0x50] ss:$8 sps:$4 sm:$0xff]  }
 0x19b   : > { %v908_v54 = vmax.bf16 %v3289_v0, %v876_v45  ;;  %1809 = vmatpush1.bf16.msra.mxu1 %v3011_v43  ;;  %v3025_v43 = vld [vmem:[#allocation8 + $0x94] ss:$8 sps:$4 sm:$0xff]  }
 0x19c   : > { %v694_v50 = vpop.f32.mrb[4].mxu0  ;;  %v909_v51 = vmax.bf16 %v3289_v0, %v877_v46  ;;  %v807_v42 = vpop.f32.mrb[4].mxu1  ;;  %v3016_v46 = vld [vmem:[#allocation8 + $0x64] ss:$8 sps:$4 sm:$0xff]  }
 0x19d   : > { %v696_v55 = vpop.f32.mrb[5].mxu0  ;;  %v695_v59 = vadd.f32 %v694_v50, %v3604_v32  ;;  %v3646_v44 = vadd.f32 %v807_v42, %v3617_v62  ;;  %v809_v45 = vpop.f32.mrb[5].mxu1  ;;  %1810 = vmatprep.subr.bf16.mxu1 %v3016_v46 }
 0x19e   : > { %v698_v57 = vpop.f32.mrb[6].mxu0  ;;  %1368 = vmatprep.mubr.bf16.mxu0 %v909_v51  ;;  %v697_v1 = vadd.f32 %v696_v55, %v3607_v34  ;;  %v3650_v50 = vadd.f32 %v809_v45, %v3621_v4  ;;  %v811_v51 = vpop.f32.mrb[6].mxu1 }
 0x19f   : > { %v699_v60 = vadd.f32 %v698_v57, %v3604_v32  ;;  %v700_v61 = vpop.f32.mrb[7].mxu0  ;;  %1369 = vmatmul.mubr.bf16.vlgmr.msra.gmra.mrb[32].mxu0 %v908_v54  ;;  %v2965_v54 = vld [vmem:[#allocation7 + $0x154] ss:$8 sps:$4 sm:$0xff]   ;;  %v3654_v55 = vadd.f32 %v811_v51, %v3617_v62  ;;  %v2974_v51 = vld [vmem:[#allocation7 + $0x184] ss:$8 sps:$4 sm:$0xff]  }
 0x1a0   : > { %v701_v2 = vadd.f32 %v700_v61, %v3607_v34  ;;  %1450 = vmatpush1.bf16.msra.mxu0 %v2948_v52 }
 0x1a1   : > { %v880_v5 = vpack.c.bf16 %v699_v60, %v695_v59  ;;  %1451 = vmatprep.subr.bf16.mxu0 %v2953_v56  ;;  %v813_v56 = vpop.f32.mrb[7].mxu1  ;;  %v3014_v59 = vld [vmem:[#allocation8 + $0x60] ss:$8 sps:$4 sm:$0xff]  }
 0x1a2   : > { %v881_v7 = vpack.c.bf16 %v701_v2, %v697_v1  ;;  %v3657_v58 = vadd.f32 %v813_v56, %v3621_v4  ;;  %v882_v1 = vpack.c.bf16 %v3654_v55, %v3646_v44  ;;  %v3019_v2 = vld [vmem:[#allocation8 + $0x74] ss:$8 sps:$4 sm:$0xff]   ;;  %1811 = vmatpush1.bf16.msra.mxu1 %v3014_v59  ;;  %v3028_v59 = vld [vmem:[#allocation8 + $0xa4] ss:$8 sps:$4 sm:$0xff]  }
 0x1a3   : > { %v912_v19 = vmax.bf16 %v3289_v0, %v880_v5  ;;  %1812 = vmatprep.subr.bf16.mxu1 %v3019_v2 }
 0x1a4   : > { %1452 = vmatpush1.bf16.msra.mxu0 %v2951_v3  ;;  %v704_v13 = vpop.f32.mrb[8].mxu0  ;;  %v913_v14 = vmax.bf16 %v3289_v0, %v881_v7  ;;  %v883_v7 = vpack.c.bf16 %v3657_v58, %v3650_v50  ;;  %v817_v12 = vpop.f32.mrb[8].mxu1  ;;  %v914_v10 = vmax.bf16 %v3289_v0, %v882_v1 }
 0x1a5   : > { %v706_v18 = vpop.f32.mrb[9].mxu0  ;;  %1453 = vmatprep.subr.bf16.mxu0 %v2956_v6  ;;  %v705_v26 = vadd.f32 %v704_v13, %v3604_v32  ;;  %v2963_v6 = vld [vmem:[#allocation7 + $0x150] ss:$8 sps:$4 sm:$0xff]  }
 0x1a6   : > { %v708_v23 = vpop.f32.mrb[10].mxu0  ;;  %1378 = vmatprep.mubr.bf16.mxu0 %v913_v14  ;;  %v707_v35 = vadd.f32 %v706_v18, %v3607_v34  ;;  %v3017_v13 = vld [vmem:[#allocation8 + $0x70] ss:$8 sps:$4 sm:$0xff]   ;;  %v3668_v14 = vadd.f32 %v817_v12, %v3617_v62 }
 0x1a7   : > { %v709_v27 = vadd.f32 %v708_v23, %v3604_v32  ;;  %v710_v28 = vpop.f32.mrb[11].mxu0  ;;  %1379 = vmatmul.mubr.bf16.gmra.mrb[36].mxu0 %v912_v19  ;;  %1813 = vmatpush1.bf16.msra.mxu1 %v3017_v13 }
 0x1a8   : > { %v711_v36 = vadd.f32 %v710_v28, %v3607_v34  ;;  %1454 = vmatpush1.bf16.msra.mxu0 %v2954_v15  ;;  %v819_v15 = vpop.f32.mrb[9].mxu1  ;;  %1814 = vmatprep.subr.bf16.mxu1 %v3022_v17 }
 0x1a9   : > { %v884_v39 = vpack.c.bf16 %v709_v27, %v705_v26  ;;  %1455 = vmatprep.subr.bf16.mxu0 %v2959_v20  ;;  %v2966_v20 = vld [vmem:[#allocation7 + $0x160] ss:$8 sps:$4 sm:$0xff]   ;;  %v3672_v22 = vadd.f32 %v819_v15, %v3621_v4  ;;  %v821_v23 = vpop.f32.mrb[10].mxu1  ;;  %v2971_v27 = vld [vmem:[#allocation7 + $0x174] ss:$8 sps:$4 sm:$0xff]  }
 0x1aa   : > { %v885_v41 = vpack.c.bf16 %v711_v36, %v707_v35  ;;  %v3676_v28 = vadd.f32 %v821_v23, %v3617_v62  ;;  %v823_v33 = vpop.f32.mrb[11].mxu1  ;;  %v3026_v15 = vld [vmem:[#allocation8 + $0xa0] ss:$8 sps:$4 sm:$0xff]   ;;  %v3031_v23 = vld [vmem:[#allocation8 + $0xb4] ss:$8 sps:$4 sm:$0xff]  }
 0x1ab   : > { %v916_v53 = vmax.bf16 %v3289_v0, %v884_v39  ;;  %v3679_v36 = vadd.f32 %v823_v33, %v3621_v4 }
 0x1ac   : > { %1456 = vmatpush1.bf16.msra.mxu0 %v2957_v37  ;;  %v714_v47 = vpop.f32.mrb[12].mxu0  ;;  %v917_v48 = vmax.bf16 %v3289_v0, %v885_v41  ;;  %v3020_v37 = vld [vmem:[#allocation8 + $0x80] ss:$8 sps:$4 sm:$0xff]   ;;  %v886_v42 = vpack.c.bf16 %v3676_v28, %v3668_v14  ;;  %v3040_v28 = vld [vmem:[#allocation8 + $0xe4] ss:$8 sps:$4 sm:$0xff]  }
 0x1ad   : > { %v716_v52 = vpop.f32.mrb[13].mxu0  ;;  %1457 = vmatprep.subr.bf16.mxu0 %v2962_v40  ;;  %v715_v60 = vadd.f32 %v714_v47, %v3604_v32  ;;  %v2969_v47 = vld [vmem:[#allocation7 + $0x170] ss:$8 sps:$4 sm:$0xff]   ;;  %1815 = vmatpush1.bf16.msra.mxu1 %v3020_v37  ;;  %v2980_v37 = vld [vmem:[#allocation7 + $0x1a4] ss:$8 sps:$4 sm:$0xff]  }
 0x1ae   : > { %v718_v57 = vpop.f32.mrb[14].mxu0  ;;  %1388 = vmatprep.mubr.bf16.mxu0 %v917_v48  ;;  %v717_v3 = vadd.f32 %v716_v52, %v3607_v34  ;;  %v887_v48 = vpack.c.bf16 %v3679_v36, %v3672_v22  ;;  %1816 = vmatprep.subr.bf16.mxu1 %v3025_v43  ;;  %v3038_v36 = vld [vmem:[#allocation8 + $0xe0] ss:$8 sps:$4 sm:$0xff]  }
 0x1af   : > { %v719_v61 = vadd.f32 %v718_v57, %v3604_v32  ;;  %v720_v63 = vpop.f32.mrb[15].mxu0  ;;  %1389 = vmatmul.mubr.bf16.gmra.mrb[40].mxu0 %v916_v53  ;;  %v827_v53 = vpop.f32.mrb[12].mxu1 }
 0x1b0   : > { %v721_v5 = vadd.f32 %v720_v63, %v3607_v34  ;;  %1458 = vmatpush1.bf16.msra.mxu0 %v2960_v49  ;;  %v3690_v56 = vadd.f32 %v827_v53, %v3617_v62  ;;  %v829_v57 = vpop.f32.mrb[13].mxu1  ;;  %v2972_v63 = vld [vmem:[#allocation7 + $0x180] ss:$8 sps:$4 sm:$0xff]   ;;  %v919_v50 = vmax.bf16 %v3289_v0, %v887_v48  ;;  %v3041_v48 = vld [vmem:[#allocation8 + $0xf0] ss:$8 sps:$4 sm:$0xff]  }
 0x1b1   : > { %v888_v8 = vpack.c.bf16 %v719_v61, %v715_v60  ;;  %1459 = vmatprep.subr.bf16.mxu0 %v2965_v54  ;;  %v3023_v54 = vld [vmem:[#allocation8 + $0x90] ss:$8 sps:$4 sm:$0xff]   ;;  %v3694_v2 = vadd.f32 %v829_v57, %v3621_v4 }
 0x1b2   : > { %v889_v11 = vpack.c.bf16 %v721_v5, %v717_v3  ;;  %v831_v3 = vpop.f32.mrb[14].mxu1  ;;  %1817 = vmatpush1.bf16.msra.mxu1 %v3023_v54 }
 0x1b3   : > { %v920_v26 = vmax.bf16 %v3289_v0, %v888_v8  ;;  %v2977_v8 = vld [vmem:[#allocation7 + $0x194] ss:$8 sps:$4 sm:$0xff]   ;;  %1818 = vmatprep.subr.bf16.mxu1 %v3028_v59 }
 0x1b4   : > { %1460 = vmatpush1.bf16.msra.mxu0 %v2963_v6  ;;  %v724_v18 = vpop.f32.mrb[16].mxu0  ;;  %v921_v19 = vmax.bf16 %v3289_v0, %v889_v11  ;;  %v833_v11 = vpop.f32.mrb[15].mxu1  ;;  %v2983_v59 = vld [vmem:[#allocation7 + $0x1b4] ss:$8 sps:$4 sm:$0xff]  }
 0x1b5   : > { %v726_v25 = vpop.f32.mrb[17].mxu0  ;;  %1461 = vmatprep.subr.bf16.mxu0 %v2968_v9  ;;  %v725_v39 = vadd.f32 %v724_v18, %v3604_v32  ;;  %v3698_v9 = vadd.f32 %v831_v3, %v3617_v62  ;;  %v3701_v13 = vadd.f32 %v833_v11, %v3621_v4 }
 0x1b6   : > { %v728_v35 = vpop.f32.mrb[18].mxu0  ;;  %1398 = vmatprep.mubr.bf16.mxu0 %v921_v19  ;;  %v727_v45 = vadd.f32 %v726_v25, %v3607_v34  ;;  %1819 = vmatpush1.bf16.msra.mxu1 %v3026_v15  ;;  %v3037_v15 = vld [vmem:[#allocation8 + $0xd4] ss:$8 sps:$4 sm:$0xff]  }
 0x1b7   : > { %v729_v40 = vadd.f32 %v728_v35, %v3604_v32  ;;  %v730_v41 = vpop.f32.mrb[19].mxu0  ;;  %1399 = vmatmul.mubr.bf16.gmra.mrb[44].mxu0 %v920_v26  ;;  %v891_v33 = vpack.c.bf16 %v3701_v13, %v3694_v2  ;;  %1820 = vmatprep.subr.bf16.mxu1 %v3031_v23  ;;  %v1004_v2 = vld [vmem:[%s4015_s4] sm:$0x3] }
 0x1b8   : > { %v731_v46 = vadd.f32 %v730_v41, %v3607_v34  ;;  %1462 = vmatpush1.bf16.msra.mxu0 %v2966_v20  ;;  %v890_v20 = vpack.c.bf16 %v3698_v9, %v3690_v56  ;;  %v3029_v41 = vld [vmem:[#allocation8 + $0xb0] ss:$8 sps:$4 sm:$0xff]   ;;  %v3044_v56 = vld [vmem:[#allocation10 + $0x40] sm:$0xff]   ;;  %v3818_v9 = vrot.slane %v1004_v2, %v3596_v29 }
 0x1b9   : > { %v892_v49 = vpack.c.bf16 %v729_v40, %v725_v39  ;;  %1463 = vmatprep.subr.bf16.mxu0 %v2971_v27  ;;  %v2975_v27 = vld [vmem:[#allocation7 + $0x190] ss:$8 sps:$4 sm:$0xff]   ;;  %v837_v40 = vpop.f32.mrb[16].mxu1 }
 0x1ba   : > { %v893_v52 = vpack.c.bf16 %v731_v46, %v727_v45  ;;  %v3712_v43 = vadd.f32 %v837_v40, %v3617_v62  ;;  %v839_v45 = vpop.f32.mrb[17].mxu1  ;;  %v3034_v46 = vld [vmem:[#allocation8 + $0xc4] ss:$8 sps:$4 sm:$0xff]   ;;  %1821 = vmatpush1.bf16.msra.mxu1 %v3029_v41 }
 0x1bb   : > { %v924_v6 = vmax.bf16 %v3289_v0, %v892_v49  ;;  %v841_v53 = vpop.f32.mrb[18].mxu1  ;;  %1822 = vmatprep.subr.bf16.mxu1 %v3034_v46  ;;  %v2984_v46 = vld [vmem:[#allocation7 + $0x1c0] ss:$8 sps:$4 sm:$0xff]  }
 0x1bc   : > { %1464 = vmatpush1.bf16.msra.mxu0 %v2969_v47  ;;  %v734_v60 = vpop.f32.mrb[20].mxu0  ;;  %v925_v61 = vmax.bf16 %v3289_v0, %v893_v52  ;;  %v3716_v52 = vadd.f32 %v839_v45, %v3621_v4 }
 0x1bd   : > { %v736_v5 = vpop.f32.mrb[21].mxu0  ;;  %1465 = vmatprep.subr.bf16.mxu0 %v2974_v51  ;;  %v735_v17 = vadd.f32 %v734_v60, %v3604_v32  ;;  %v2978_v51 = vld [vmem:[#allocation7 + $0x1a0] ss:$8 sps:$4 sm:$0xff]   ;;  %v3720_v60 = vadd.f32 %v841_v53, %v3617_v62 }
 0x1be   : > { %v738_v12 = vpop.f32.mrb[22].mxu0  ;;  %1408 = vmatprep.mubr.bf16.mxu0 %v925_v61  ;;  %v737_v25 = vadd.f32 %v736_v5, %v3607_v34  ;;  %v843_v61 = vpop.f32.mrb[19].mxu1  ;;  %v3032_v5 = vld [vmem:[#allocation8 + $0xc0] ss:$8 sps:$4 sm:$0xff]  }
 0x1bf   : > { %v739_v18 = vadd.f32 %v738_v12, %v3604_v32  ;;  %v740_v19 = vpop.f32.mrb[23].mxu0  ;;  %1409 = vmatmul.mubr.bf16.gmra.mrb[48].mxu0 %v924_v6  ;;  %v3723_v3 = vadd.f32 %v843_v61, %v3621_v4  ;;  %v894_v12 = vpack.c.bf16 %v3720_v60, %v3712_v43  ;;  %1823 = vmatpush1.bf16.msra.mxu1 %v3032_v5 }
 0x1c0   : > { %v741_v26 = vadd.f32 %v740_v19, %v3607_v34  ;;  %1466 = vmatpush1.bf16.msra.mxu0 %v2972_v63  ;;  %v2981_v19 = vld [vmem:[#allocation7 + $0x1b0] ss:$8 sps:$4 sm:$0xff]   ;;  %1824 = vmatprep.subr.bf16.mxu1 %v3037_v15 }
 0x1c1   : > { %v896_v35 = vpack.c.bf16 %v739_v18, %v735_v17  ;;  %1467 = vmatprep.subr.bf16.mxu0 %v2977_v8  ;;  %v895_v23 = vpack.c.bf16 %v3723_v3, %v3716_v52  ;;  %v926_v55 = vmax.bf16 %v3289_v0, %v894_v12 }
 0x1c2   : > { %v897_v39 = vpack.c.bf16 %v741_v26, %v737_v25  ;;  %v2986_v26 = vld [vmem:[#allocation7 + $0x1c4] ss:$8 sps:$4 sm:$0xff]  }
 0x1c3   : > { %v928_v57 = vmax.bf16 %v3289_v0, %v896_v35  ;;  %v847_v35 = vpop.f32.mrb[20].mxu1  ;;  %v927_v21 = vmax.bf16 %v3289_v0, %v895_v23 }
 0x1c4   : > { %1468 = vmatpush1.bf16.msra.mxu0 %v2975_v27  ;;  %v744_v47 = vpop.f32.mrb[24].mxu0  ;;  %v929_v49 = vmax.bf16 %v3289_v0, %v897_v39  ;;  %v3734_v39 = vadd.f32 %v847_v35, %v3617_v62  ;;  %v849_v40 = vpop.f32.mrb[21].mxu1 }
 0x1c5   : > { %v746_v54 = vpop.f32.mrb[25].mxu0  ;;  %1469 = vmatprep.subr.bf16.mxu0 %v2980_v37  ;;  %v745_v6 = vadd.f32 %v744_v47, %v3604_v32  ;;  %v3035_v37 = vld [vmem:[#allocation8 + $0xd0] ss:$8 sps:$4 sm:$0xff]   ;;  %v3738_v47 = vadd.f32 %v849_v40, %v3621_v4 }
 0x1c6   : > { %v748_v63 = vpop.f32.mrb[26].mxu0  ;;  %1418 = vmatprep.mubr.bf16.mxu0 %v929_v49  ;;  %v747_v17 = vadd.f32 %v746_v54, %v3607_v34  ;;  %v851_v49 = vpop.f32.mrb[22].mxu1  ;;  %v2989_v54 = vld [vmem:[#allocation7 + $0x1d4] ss:$8 sps:$4 sm:$0xff]   ;;  %1825 = vmatpush1.bf16.msra.mxu1 %v3035_v37 }
 0x1c7   : > { %v749_v8 = vadd.f32 %v748_v63, %v3604_v32  ;;  %v750_v11 = vpop.f32.mrb[27].mxu0  ;;  %1419 = vmatmul.mubr.bf16.gmra.mrb[52].mxu0 %v928_v57  ;;  %v3742_v57 = vadd.f32 %v851_v49, %v3617_v62  ;;  %v2995_v49 = vld [vmem:[#allocation7 + $0x1f4] ss:$8 sps:$4 sm:$0xff]   ;;  %1826 = vmatprep.subr.bf16.mxu1 %v3040_v28 }
 0x1c8   : > { %v751_v18 = vadd.f32 %v750_v11, %v3607_v34  ;;  %1470 = vmatpush1.bf16.msra.mxu0 %v2978_v51 }
 0x1c9   : > { %v900_v25 = vpack.c.bf16 %v749_v8, %v745_v6  ;;  %1471 = vmatprep.subr.bf16.mxu0 %v2983_v59  ;;  %v853_v59 = vpop.f32.mrb[23].mxu1  ;;  %v898_v11 = vpack.c.bf16 %v3742_v57, %v3734_v39 }
 0x1ca   : > { %v901_v27 = vpack.c.bf16 %v751_v18, %v747_v17  ;;  %v3745_v63 = vadd.f32 %v853_v59, %v3621_v4  ;;  %v2987_v18 = vld [vmem:[#allocation7 + $0x1d0] ss:$8 sps:$4 sm:$0xff]   ;;  %v857_v35 = vpop.f32.mrb[24].mxu1  ;;  %1827 = vmatpush1.bf16.msra.mxu1 %v3038_v36  ;;  %v3055_v36 = vld [vmem:[#allocation10 + $0x28] sm:$0xff]  }
 0x1cb   : > { %v932_v53 = vmax.bf16 %v3289_v0, %v900_v25  ;;  %v859_v37 = vpop.f32.mrb[25].mxu1  ;;  %v930_v1 = vmax.bf16 %v3289_v0, %v898_v11 }
 0x1cc   : > { %1472 = vmatpush1.bf16.msra.mxu0 %v2981_v19  ;;  %v754_v41 = vpop.f32.mrb[28].mxu0  ;;  %v933_v45 = vmax.bf16 %v3289_v0, %v901_v27  ;;  %v899_v19 = vpack.c.bf16 %v3745_v63, %v3738_v47 }
 0x1cd   : > { %v756_v51 = vpop.f32.mrb[29].mxu0  ;;  %1473 = vmatprep.subr.bf16.mxu0 %v2986_v26  ;;  %v755_v5 = vadd.f32 %v754_v41, %v3604_v32  ;;  %v2992_v26 = vld [vmem:[#allocation7 + $0x1e4] ss:$8 sps:$4 sm:$0xff]   ;;  %v2990_v41 = vld [vmem:[#allocation7 + $0x1e0] ss:$8 sps:$4 sm:$0xff]  }
 0x1ce   : > { %v758_v61 = vpop.f32.mrb[30].mxu0  ;;  %1428 = vmatprep.mubr.bf16.mxu0 %v933_v45  ;;  %v757_v15 = vadd.f32 %v756_v51, %v3607_v34  ;;  %v860_v45 = vadd.f32 %v859_v37, %v3621_v4  ;;  %v931_v44 = vmax.bf16 %v3289_v0, %v899_v19 }
 0x1cf   : > { %v759_v6 = vadd.f32 %v758_v61, %v3604_v32  ;;  %v760_v8 = vpop.f32.mrb[31].mxu0  ;;  %1429 = vmatmul.mubr.bf16.gmra.mrb[56].mxu0 %v932_v53  ;;  %v858_v32 = vadd.f32 %v857_v35, %v3617_v62  ;;  %v2993_v61 = vld [vmem:[#allocation7 + $0x1f0] ss:$8 sps:$4 sm:$0xff]   ;;  %v3045_v35 = vld [vmem:[#allocation10] sm:$0xff]  }
 0x1d0   : > { %v761_v17 = vadd.f32 %v760_v8, %v3607_v34  ;;  %1474 = vmatpush1.bf16.msra.mxu0 %v2984_v46  ;;  %v911_v34 = vmax.bf16 %v3289_v0, %v879_v38  ;;  %v861_v46 = vpop.f32.mrb[26].mxu1 }
 0x1d1   : > { %v904_v25 = vpack.c.bf16 %v759_v6, %v755_v5  ;;  %1475 = vmatprep.subr.bf16.mxu0 %v2989_v54  ;;  %v862_v51 = vadd.f32 %v861_v46, %v3617_v62  ;;  %v863_v53 = vpop.f32.mrb[27].mxu1  ;;  %v915_v5 = vmax.bf16 %v3289_v0, %v883_v7 }
 0x1d2   : > { %v905_v27 = vpack.c.bf16 %v761_v17, %v757_v15  ;;  %v864_v54 = vadd.f32 %v863_v53, %v3621_v4  ;;  %v867_v24 = vpop.f32.mrb[28].mxu1  ;;  %v910_v15 = vmax.bf16 %v3289_v0, %v878_v30  ;;  %v922_v30 = vmax.bf16 %v3289_v0, %v890_v20 }
 0x1d3   : > { %v936_v47 = vmax.bf16 %v3289_v0, %v904_v25  ;;  %v902_v59 = vpack.c.bf16 %v862_v51, %v858_v32  ;;  %v868_v38 = vadd.f32 %v867_v24, %v3617_v62  ;;  %v869_v63 = vpop.f32.mrb[29].mxu1  ;;  %v3821_v20 = vrot.slane %v1004_v2, %v3601_v31  ;;  %v3047_v51 = vld [vmem:[#allocation10 + $0x8] sm:$0xff]   ;;  %v3049_v24 = vld [vmem:[#allocation10 + $0x10] sm:$0xff]  }
 0x1d4   : > { %1476 = vmatpush1.bf16.msra.mxu0 %v2987_v18  ;;  %v937_v40 = vmax.bf16 %v3289_v0, %v905_v27  ;;  %v903_v16 = vpack.c.bf16 %v864_v54, %v860_v45  ;;  %v870_v6 = vadd.f32 %v869_v63, %v3621_v4  ;;  %v871_v8 = vpop.f32.mrb[30].mxu1  ;;  %v3048_v54 = vld [vmem:[#allocation10 + $0x50] sm:$0xff]  }
 0x1d5   : > { %1477 = vmatprep.subr.bf16.mxu0 %v2992_v26  ;;  %v872_v17 = vadd.f32 %v871_v8, %v3617_v62  ;;  %v873_v18 = vpop.f32.mrb[31].mxu1  ;;  %v923_v62 = vmax.bf16 %v3289_v0, %v891_v33  ;;  %v934_v14 = vmax.bf16 %v3289_v0, %v902_v59 }
 0x1d6   : > { %1438 = vmatprep.mubr.bf16.mxu0 %v937_v40  ;;  %v874_v25 = vadd.f32 %v873_v18, %v3621_v4  ;;  %v918_v4 = vmax.bf16 %v3289_v0, %v886_v42  ;;  %v935_v58 = vmax.bf16 %v3289_v0, %v903_v16  ;;  %v3043_v42 = vld [vmem:[#allocation8 + $0xf4] ss:$8 sps:$4 sm:$0xff]   ;;  %v3046_v40 = vld [vmem:[#allocation10 + $0x48] sm:$0xff]  }
 0x1d7   : > { %1439 = vmatmul.mubr.bf16.gmra.mrb[60].mxu0 %v936_v47  ;;  %v906_v26 = vpack.c.bf16 %v872_v17, %v868_v38  ;;  %1828 = vmatprep.subr.bf16.mxu1 %v3043_v42 }
 0x1d8   : > { %1478 = vmatpush1.bf16.msra.mxu0 %v2990_v41  ;;  %1481 = vmatprep.mubr.bf16.mxu0 %v911_v34  ;;  %v907_v27 = vpack.c.bf16 %v874_v25, %v870_v6 }
 0x1d9   : > { %1479 = vmatprep.subr.bf16.mxu0 %v2995_v49  ;;  %v938_v22 = vmax.bf16 %v3289_v0, %v906_v26  ;;  %1829 = vmatpush1.bf16.msra.mxu1 %v3041_v48  ;;  %v3051_v26 = vld [vmem:[#allocation10 + $0x18] sm:$0xff]   ;;  %v3056_v48 = vld [vmem:[#allocation10 + $0x70] sm:$0xff]  }
 0x1da   : > { %v939_v7 = vmax.bf16 %v3289_v0, %v907_v27  ;;  %2628 = vmatprep.subr.bf16.mxu1 %v3044_v56 }
 0x1dc   : > { %1480 = vmatpush1.bf16.msra.mxu0 %v2993_v61 }
 0x1df   : > { %1482 = vmatmul.mubr.bf16.vlgmr.msra.gmra.mrb[32].mxu0 %v910_v15 }
 0x1e0   : > { %1491 = vmatprep.mubr.bf16.mxu0 %v915_v5  ;;  %v3050_v5 = vld [vmem:[#allocation10 + $0x58] sm:$0xff]  }
 0x1e7   : > { %1492 = vmatmul.mubr.bf16.gmra.mrb[36].mxu0 %v914_v10 }
 0x1e8   : > { %1501 = vmatprep.mubr.bf16.mxu0 %v919_v50  ;;  %v3052_v50 = vld [vmem:[#allocation10 + $0x60] sm:$0xff]  }
 0x1ef   : > { %1502 = vmatmul.mubr.bf16.gmra.mrb[40].mxu0 %v918_v4 }
 0x1f0   : > { %1511 = vmatprep.mubr.bf16.mxu0 %v923_v62 }
 0x1f7   : > { %1512 = vmatmul.mubr.bf16.gmra.mrb[44].mxu0 %v922_v30 }
 0x1f8   : > { %1521 = vmatprep.mubr.bf16.mxu0 %v927_v21  ;;  %v3053_v21 = vld [vmem:[#allocation10 + $0x20] sm:$0xff]  }
 0x1ff   : > { %1522 = vmatmul.mubr.bf16.gmra.mrb[48].mxu0 %v926_v55  ;;  %v3054_v55 = vld [vmem:[#allocation10 + $0x68] sm:$0xff]  }
 0x200   : > { %1531 = vmatprep.mubr.bf16.mxu0 %v931_v44 }
 0x207   : > { %1532 = vmatmul.mubr.bf16.gmra.mrb[52].mxu0 %v930_v1 }
 0x208   : > { %1541 = vmatprep.mubr.bf16.mxu0 %v935_v58 }
 0x20f   : > { %1542 = vmatmul.mubr.bf16.gmra.mrb[56].mxu0 %v934_v14 }
 0x210   : > { %1551 = vmatprep.mubr.bf16.mxu0 %v939_v7 }
 0x217   : > { %1552 = vmatmul.mubr.bf16.gmra.mrb[60].mxu0 %v938_v22 }
 0x2b2   : > { %v1483_v13 = vpop.f32.mrb[32].mxu0 }
 0x2b3   : > { %v1485_v33 = vpop.f32.mrb[33].mxu0  ;;  %v2692_v52 = vadd.f32 %v1483_v13, %v3818_v9 }
 0x2b4   : > { %v1487_v43 = vpop.f32.mrb[34].mxu0  ;;  %v2693_v12 = vadd.f32 %v1485_v33, %v3821_v20  ;;  %v3057_v33 = vld [vmem:[#allocation10 + $0x30] sm:$0xff]  }
 0x2b5   : > { %v2694_v60 = vadd.f32 %v1487_v43, %v3818_v9  ;;  %v1489_v3 = vpop.f32.mrb[35].mxu0 }
 0x2b6   : > { %v2695_v23 = vadd.f32 %v1489_v3, %v3821_v20 }
 0x2b7   : > { %v1562_v39 = vpack.c.bf16 %v2694_v60, %v2692_v52 }
 0x2b8   : > { %v1563_v57 = vpack.c.bf16 %v2695_v23, %v2693_v12 }
 0x2b9   : > { %v1578_v32 = vmax.bf16 %v3289_v0, %v1562_v39 }
 0x2ba   : > { %v1493_v11 = vpop.f32.mrb[36].mxu0  ;;  %v1579_v19 = vmax.bf16 %v3289_v0, %v1563_v57 }
 0x2bb   : > { %v1495_v37 = vpop.f32.mrb[37].mxu0  ;;  %v2696_v34 = vadd.f32 %v1493_v11, %v3818_v9 }
 0x2bc   : > { %v1497_v41 = vpop.f32.mrb[38].mxu0  ;;  %1830 = vmatprep.mubr.bf16.mxu1 %v1579_v19  ;;  %v2697_v47 = vadd.f32 %v1495_v37, %v3821_v20 }
 0x2bd   : > { %v2698_v45 = vadd.f32 %v1497_v41, %v3818_v9  ;;  %v1499_v46 = vpop.f32.mrb[39].mxu0  ;;  %1831 = vmatmul.mubr.bf16.vlgmr.msra.gmra.mrb[32].mxu1 %v1578_v32 }
 0x2be   : > { %v2699_v49 = vadd.f32 %v1499_v46, %v3821_v20  ;;  %2629 = vmatpush3.bf16.msra.mxu1 %v3045_v35 }
 0x2bf   : > { %v1564_v53 = vpack.c.bf16 %v2698_v45, %v2696_v34  ;;  %2630 = vmatprep.subr.bf16.mxu1 %v3046_v40 }
 0x2c0   : > { %v1565_v59 = vpack.c.bf16 %v2699_v49, %v2697_v47 }
 0x2c1   : > { %v1580_v63 = vmax.bf16 %v3289_v0, %v1564_v53 }
 0x2c2   : > { %v1503_v61 = vpop.f32.mrb[40].mxu0  ;;  %v1581_v16 = vmax.bf16 %v3289_v0, %v1565_v59  ;;  %2631 = vmatpush3.bf16.msra.mxu1 %v3047_v51 }
 0x2c3   : > { %v1505_v38 = vpop.f32.mrb[41].mxu0  ;;  %2632 = vmatprep.subr.bf16.mxu1 %v3048_v54  ;;  %v2700_v8 = vadd.f32 %v1503_v61, %v3818_v9 }
 0x2c4   : > { %v1507_v6 = vpop.f32.mrb[42].mxu0  ;;  %1840 = vmatprep.mubr.bf16.mxu1 %v1581_v16  ;;  %v2701_v18 = vadd.f32 %v1505_v38, %v3821_v20 }
 0x2c5   : > { %v2702_v15 = vadd.f32 %v1507_v6, %v3818_v9  ;;  %v1509_v17 = vpop.f32.mrb[43].mxu0  ;;  %1841 = vmatmul.mubr.bf16.gmra.mrb[36].mxu1 %v1580_v63 }
 0x2c6   : > { %v2703_v25 = vadd.f32 %v1509_v17, %v3821_v20  ;;  %2633 = vmatpush3.bf16.msra.mxu1 %v3049_v24 }
 0x2c7   : > { %v1566_v27 = vpack.c.bf16 %v2702_v15, %v2700_v8  ;;  %2634 = vmatprep.subr.bf16.mxu1 %v3050_v5 }
 0x2c8   : > { %v1567_v10 = vpack.c.bf16 %v2703_v25, %v2701_v18 }
 0x2c9   : > { %v1582_v44 = vmax.bf16 %v3289_v0, %v1566_v27 }
 0x2ca   : > { %v1513_v62 = vpop.f32.mrb[44].mxu0  ;;  %v1583_v4 = vmax.bf16 %v3289_v0, %v1567_v10  ;;  %2635 = vmatpush3.bf16.msra.mxu1 %v3051_v26 }
 0x2cb   : > { %v1515_v30 = vpop.f32.mrb[45].mxu0  ;;  %2636 = vmatprep.subr.bf16.mxu1 %v3052_v50  ;;  %v2704_v1 = vadd.f32 %v1513_v62, %v3818_v9 }
 0x2cc   : > { %v1517_v58 = vpop.f32.mrb[46].mxu0  ;;  %1850 = vmatprep.mubr.bf16.mxu1 %v1583_v4  ;;  %v2705_v22 = vadd.f32 %v1515_v30, %v3821_v20 }
 0x2cd   : > { %v2706_v7 = vadd.f32 %v1517_v58, %v3818_v9  ;;  %v1519_v14 = vpop.f32.mrb[47].mxu0  ;;  %1851 = vmatmul.mubr.bf16.gmra.mrb[40].mxu1 %v1582_v44 }
 0x2ce   : > { %v2707_v28 = vadd.f32 %v1519_v14, %v3821_v20  ;;  %2637 = vmatpush3.bf16.msra.mxu1 %v3053_v21  ;;  %v3059_v14 = vld [vmem:[#allocation10 + $0x38] sm:$0xff]  }
 0x2cf   : > { %v1568_v42 = vpack.c.bf16 %v2706_v7, %v2704_v1  ;;  %2638 = vmatprep.subr.bf16.mxu1 %v3054_v55  ;;  %v3058_v7 = vld [vmem:[#allocation10 + $0x78] sm:$0xff]  }
 0x2d0   : > { %v1569_v56 = vpack.c.bf16 %v2707_v28, %v2705_v22 }
 0x2d1   : > { %v1584_v52 = vmax.bf16 %v3289_v0, %v1568_v42 }
 0x2d2   : > { %v1523_v2 = vpop.f32.mrb[48].mxu0  ;;  %v1585_v13 = vmax.bf16 %v3289_v0, %v1569_v56  ;;  %2639 = vmatpush3.bf16.msra.mxu1 %v3055_v36 }
 0x2d3   : > { %v1525_v43 = vpop.f32.mrb[49].mxu0  ;;  %2640 = vmatprep.subr.bf16.mxu1 %v3056_v48  ;;  %v2708_v3 = vadd.f32 %v1523_v2, %v3818_v9 }
 0x2d4   : > { %v1527_v60 = vpop.f32.mrb[50].mxu0  ;;  %1860 = vmatprep.mubr.bf16.mxu1 %v1585_v13  ;;  %v2709_v39 = vadd.f32 %v1525_v43, %v3821_v20 }
 0x2d5   : > { %v2710_v12 = vadd.f32 %v1527_v60, %v3818_v9  ;;  %v1529_v23 = vpop.f32.mrb[51].mxu0  ;;  %1861 = vmatmul.mubr.bf16.gmra.mrb[44].mxu1 %v1584_v52 }
 0x2d6   : > { %v2711_v57 = vadd.f32 %v1529_v23, %v3821_v20  ;;  %2641 = vmatpush3.bf16.msra.mxu1 %v3057_v33 }
 0x2d7   : > { %v1570_v11 = vpack.c.bf16 %v2710_v12, %v2708_v3  ;;  %2642 = vmatprep.subr.bf16.mxu1 %v3058_v7 }
 0x2d8   : > { %v1571_v19 = vpack.c.bf16 %v2711_v57, %v2709_v39 }
 0x2d9   : > { %v1586_v40 = vmax.bf16 %v3289_v0, %v1570_v11 }
 0x2da   : > { %v1533_v35 = vpop.f32.mrb[52].mxu0  ;;  %v1587_v32 = vmax.bf16 %v3289_v0, %v1571_v19  ;;  %2643 = vmatpush3.bf16.msra.mxu1 %v3059_v14 }
 0x2db   : > { %v1535_v37 = vpop.f32.mrb[53].mxu0  ;;  %v2712_v34 = vadd.f32 %v1533_v35, %v3818_v9 }
 0x2dc   : > { %v1537_v41 = vpop.f32.mrb[54].mxu0  ;;  %1870 = vmatprep.mubr.bf16.mxu1 %v1587_v32  ;;  %v2713_v47 = vadd.f32 %v1535_v37, %v3821_v20 }
 0x2dd   : > { %v2714_v45 = vadd.f32 %v1537_v41, %v3818_v9  ;;  %v1539_v46 = vpop.f32.mrb[55].mxu0  ;;  %1871 = vmatmul.mubr.bf16.gmra.mrb[48].mxu1 %v1586_v40 }
 0x2de   : > { %v2715_v49 = vadd.f32 %v1539_v46, %v3821_v20 }
 0x2df   : > { %v1572_v51 = vpack.c.bf16 %v2714_v45, %v2712_v34 }
 0x2e0   : > { %v1573_v53 = vpack.c.bf16 %v2715_v49, %v2713_v47 }
 0x2e1   : > { %v1588_v16 = vmax.bf16 %v3289_v0, %v1572_v51 }
 0x2e2   : > { %v1543_v54 = vpop.f32.mrb[56].mxu0  ;;  %v1589_v59 = vmax.bf16 %v3289_v0, %v1573_v53 }
 0x2e3   : > { %v1545_v61 = vpop.f32.mrb[57].mxu0  ;;  %v2716_v38 = vadd.f32 %v1543_v54, %v3818_v9 }
 0x2e4   : > { %v1547_v24 = vpop.f32.mrb[58].mxu0  ;;  %1880 = vmatprep.mubr.bf16.mxu1 %v1589_v59  ;;  %v2717_v6 = vadd.f32 %v1545_v61, %v3821_v20 }
 0x2e5   : > { %v2718_v63 = vadd.f32 %v1547_v24, %v3818_v9  ;;  %v1549_v5 = vpop.f32.mrb[59].mxu0  ;;  %1881 = vmatmul.mubr.bf16.gmra.mrb[52].mxu1 %v1588_v16 }
 0x2e6   : > { %v2719_v8 = vadd.f32 %v1549_v5, %v3821_v20 }
 0x2e7   : > { %v1574_v15 = vpack.c.bf16 %v2718_v63, %v2716_v38 }
 0x2e8   : > { %v1575_v17 = vpack.c.bf16 %v2719_v8, %v2717_v6 }
 0x2e9   : > { %v1590_v27 = vmax.bf16 %v3289_v0, %v1574_v15 }
 0x2ea   : > { %v1553_v18 = vpop.f32.mrb[60].mxu0  ;;  %v1591_v25 = vmax.bf16 %v3289_v0, %v1575_v17 }
 0x2eb   : > { %v1555_v26 = vpop.f32.mrb[61].mxu0  ;;  %v2720_v10 = vadd.f32 %v1553_v18, %v3818_v9 }
 0x2ec   : > { %v1557_v50 = vpop.f32.mrb[62].mxu0  ;;  %1890 = vmatprep.mubr.bf16.mxu1 %v1591_v25  ;;  %v2721_v21 = vadd.f32 %v1555_v26, %v3821_v20 }
 0x2ed   : > { %v2722_v62 = vadd.f32 %v1557_v50, %v3818_v9  ;;  %v1559_v4 = vpop.f32.mrb[63].mxu0  ;;  %1891 = vmatmul.mubr.bf16.gmra.mrb[56].mxu1 %v1590_v27  ;;  %v1626_v9 = vld [vmem:[%s4017_s6] sm:$0x3] }
 0x2ee   : > { %v2723_v30 = vadd.f32 %v1559_v4, %v3821_v20  ;;  %v3875_v22 = vrot.slane %v1626_v9, %v3596_v29  ;;  %v3878_v28 = vrot.slane %v1626_v9, %v3601_v31 }
 0x2ef   : > { %v1576_v44 = vpack.c.bf16 %v2722_v62, %v2720_v10 }
 0x2f0   : > { %v1577_v55 = vpack.c.bf16 %v2723_v30, %v2721_v21 }
 0x2f1   : > { %v1592_v1 = vmax.bf16 %v3289_v0, %v1576_v44 }
 0x2f2   : > { %v1593_v58 = vmax.bf16 %v3289_v0, %v1577_v55 }
 0x2f4   : > { %1900 = vmatprep.mubr.bf16.mxu1 %v1593_v58 }
 0x2f5   : > { %1901 = vmatmul.mubr.bf16.gmra.mrb[60].mxu1 %v1592_v1 }
 0x390   : > { %v1832_v20 = vpop.f32.mrb[32].mxu1 }
 0x391   : > { %v1834_v36 = vpop.f32.mrb[33].mxu1  ;;  %v1833_v48 = vadd.f32 %v1832_v20, %v3875_v22 }
 0x392   : > { %v1836_v42 = vpop.f32.mrb[34].mxu1  ;;  %v1835_v13 = vadd.f32 %v1834_v36, %v3878_v28 }
 0x393   : > { %v1837_v56 = vadd.f32 %v1836_v42, %v3875_v22  ;;  %v1838_v2 = vpop.f32.mrb[35].mxu1 }
 0x394   : > { %v1839_v33 = vadd.f32 %v1838_v2, %v3878_v28 }
 0x395   : > { %v1911_v43 = vpack.c.bf16 %v1837_v56, %v1833_v48 }
 0x396   : > { %v1912_v52 = vpack.c.bf16 %v1839_v33, %v1835_v13 }
 0x397   : > { %v1927_v3 = vmax.bf16 %v3289_v0, %v1911_v43 }
 0x398   : > { %v1842_v60 = vpop.f32.mrb[36].mxu1  ;;  %v1928_v29 = vmax.bf16 %v3289_v0, %v1912_v52 }
 0x399   : > { %v1844_v31 = vpop.f32.mrb[37].mxu1  ;;  %v1843_v23 = vadd.f32 %v1842_v60, %v3875_v22 }
 0x39a   : > { %v1846_v12 = vpop.f32.mrb[38].mxu1  ;;  %2110 = vmatprep.mubr.bf16.mxu1 %v1928_v29  ;;  %v1845_v11 = vadd.f32 %v1844_v31, %v3878_v28 }
 0x39b   : > { %v1847_v39 = vadd.f32 %v1846_v12, %v3875_v22  ;;  %v1848_v57 = vpop.f32.mrb[39].mxu1  ;;  %2111 = vmatmul.mubr.bf16.vlgmr.msra.gmra.mrb[64].mxu1 %v1927_v3 }
 0x39c   : > { %v1849_v19 = vadd.f32 %v1848_v57, %v3878_v28 }
 0x39d   : > { %v1913_v35 = vpack.c.bf16 %v1847_v39, %v1843_v23 }
 0x39e   : > { %v1914_v32 = vpack.c.bf16 %v1849_v19, %v1845_v11 }
 0x39f   : > { %v1929_v34 = vmax.bf16 %v3289_v0, %v1913_v35 }
 0x3a0   : > { %v1852_v37 = vpop.f32.mrb[40].mxu1  ;;  %v1930_v40 = vmax.bf16 %v3289_v0, %v1914_v32 }
 0x3a1   : > { %v1854_v41 = vpop.f32.mrb[41].mxu1  ;;  %v1853_v46 = vadd.f32 %v1852_v37, %v3875_v22 }
 0x3a2   : > { %v1856_v45 = vpop.f32.mrb[42].mxu1  ;;  %2118 = vmatprep.mubr.bf16.mxu1 %v1930_v40  ;;  %v1855_v51 = vadd.f32 %v1854_v41, %v3878_v28 }
 0x3a3   : > { %v1857_v47 = vadd.f32 %v1856_v45, %v3875_v22  ;;  %v1858_v49 = vpop.f32.mrb[43].mxu1  ;;  %2119 = vmatmul.mubr.bf16.gmra.mrb[68].mxu1 %v1929_v34 }
 0x3a4   : > { %v1859_v53 = vadd.f32 %v1858_v49, %v3878_v28 }
 0x3a5   : > { %v1915_v54 = vpack.c.bf16 %v1857_v47, %v1853_v46 }
 0x3a6   : > { %v1916_v59 = vpack.c.bf16 %v1859_v53, %v1855_v51 }
 0x3a7   : > { %v1931_v38 = vmax.bf16 %v3289_v0, %v1915_v54 }
 0x3a8   : > { %v1862_v61 = vpop.f32.mrb[44].mxu1  ;;  %v1932_v16 = vmax.bf16 %v3289_v0, %v1916_v59 }
 0x3a9   : > { %v1864_v24 = vpop.f32.mrb[45].mxu1  ;;  %v1863_v5 = vadd.f32 %v1862_v61, %v3875_v22 }
 0x3aa   : > { %v1866_v63 = vpop.f32.mrb[46].mxu1  ;;  %2126 = vmatprep.mubr.bf16.mxu1 %v1932_v16  ;;  %v1865_v15 = vadd.f32 %v1864_v24, %v3878_v28 }
 0x3ab   : > { %v1867_v6 = vadd.f32 %v1866_v63, %v3875_v22  ;;  %v1868_v8 = vpop.f32.mrb[47].mxu1  ;;  %2127 = vmatmul.mubr.bf16.gmra.mrb[72].mxu1 %v1931_v38 }
 0x3ac   : > { %v1869_v17 = vadd.f32 %v1868_v8, %v3878_v28 }
 0x3ad   : > { %v1917_v18 = vpack.c.bf16 %v1867_v6, %v1863_v5 }
 0x3ae   : > { %v1918_v25 = vpack.c.bf16 %v1869_v17, %v1865_v15 }
 0x3af   : > { %v1933_v10 = vmax.bf16 %v3289_v0, %v1917_v18 }
 0x3b0   : > { %v1872_v26 = vpop.f32.mrb[48].mxu1  ;;  %v1934_v27 = vmax.bf16 %v3289_v0, %v1918_v25 }
 0x3b1   : > { %v1874_v50 = vpop.f32.mrb[49].mxu1  ;;  %v1873_v4 = vadd.f32 %v1872_v26, %v3875_v22 }
 0x3b2   : > { %v1876_v62 = vpop.f32.mrb[50].mxu1  ;;  %2134 = vmatprep.mubr.bf16.mxu1 %v1934_v27  ;;  %v1875_v44 = vadd.f32 %v1874_v50, %v3878_v28 }
 0x3b3   : > { %v1877_v21 = vadd.f32 %v1876_v62, %v3875_v22  ;;  %v1878_v30 = vpop.f32.mrb[51].mxu1  ;;  %2135 = vmatmul.mubr.bf16.gmra.mrb[76].mxu1 %v1933_v10 }
 0x3b4   : > { %v1879_v55 = vadd.f32 %v1878_v30, %v3878_v28 }
 0x3b5   : > { %v1919_v58 = vpack.c.bf16 %v1877_v21, %v1873_v4 }
 0x3b6   : > { %v1920_v1 = vpack.c.bf16 %v1879_v55, %v1875_v44 }
 0x3b7   : > { %v1935_v20 = vmax.bf16 %v3289_v0, %v1919_v58 }
 0x3b8   : > { %v1882_v7 = vpop.f32.mrb[52].mxu1  ;;  %v1936_v14 = vmax.bf16 %v3289_v0, %v1920_v1 }
 0x3b9   : > { %v1884_v9 = vpop.f32.mrb[53].mxu1  ;;  %v1883_v42 = vadd.f32 %v1882_v7, %v3875_v22 }
 0x3ba   : > { %v1886_v36 = vpop.f32.mrb[54].mxu1  ;;  %2142 = vmatprep.mubr.bf16.mxu1 %v1936_v14  ;;  %v1885_v2 = vadd.f32 %v1884_v9, %v3878_v28 }
 0x3bb   : > { %v1887_v48 = vadd.f32 %v1886_v36, %v3875_v22  ;;  %v1888_v56 = vpop.f32.mrb[55].mxu1  ;;  %2143 = vmatmul.mubr.bf16.gmra.mrb[80].mxu1 %v1935_v20 }
 0x3bc   : > { %v1889_v13 = vadd.f32 %v1888_v56, %v3878_v28 }
 0x3bd   : > { %v1921_v33 = vpack.c.bf16 %v1887_v48, %v1883_v42 }
 0x3be   : > { %v1922_v43 = vpack.c.bf16 %v1889_v13, %v1885_v2 }
 0x3bf   : > { %v1937_v3 = vmax.bf16 %v3289_v0, %v1921_v33 }
 0x3c0   : > { %v1892_v52 = vpop.f32.mrb[56].mxu1  ;;  %v1938_v60 = vmax.bf16 %v3289_v0, %v1922_v43 }
 0x3c1   : > { %v1894_v29 = vpop.f32.mrb[57].mxu1  ;;  %v1893_v12 = vadd.f32 %v1892_v52, %v3875_v22 }
 0x3c2   : > { %v1896_v31 = vpop.f32.mrb[58].mxu1  ;;  %2150 = vmatprep.mubr.bf16.mxu1 %v1938_v60  ;;  %v1895_v57 = vadd.f32 %v1894_v29, %v3878_v28 }
 0x3c3   : > { %v1897_v23 = vadd.f32 %v1896_v31, %v3875_v22  ;;  %v1898_v39 = vpop.f32.mrb[59].mxu1  ;;  %2151 = vmatmul.mubr.bf16.gmra.mrb[84].mxu1 %v1937_v3 }
 0x3c4   : > { %v1899_v11 = vadd.f32 %v1898_v39, %v3878_v28 }
 0x3c5   : > { %v1923_v19 = vpack.c.bf16 %v1897_v23, %v1893_v12 }
 0x3c6   : > { %v1924_v35 = vpack.c.bf16 %v1899_v11, %v1895_v57 }
 0x3c7   : > { %v1939_v41 = vmax.bf16 %v3289_v0, %v1923_v19 }
 0x3c8   : > { %v1902_v32 = vpop.f32.mrb[60].mxu1  ;;  %v1940_v37 = vmax.bf16 %v3289_v0, %v1924_v35 }
 0x3c9   : > { %v1904_v40 = vpop.f32.mrb[61].mxu1  ;;  %v1903_v45 = vadd.f32 %v1902_v32, %v3875_v22 }
 0x3ca   : > { %v1906_v34 = vpop.f32.mrb[62].mxu1  ;;  %2158 = vmatprep.mubr.bf16.mxu1 %v1940_v37  ;;  %v1905_v49 = vadd.f32 %v1904_v40, %v3878_v28 }
 0x3cb   : > { %v1907_v46 = vadd.f32 %v1906_v34, %v3875_v22  ;;  %v1908_v47 = vpop.f32.mrb[63].mxu1  ;;  %2159 = vmatmul.mubr.bf16.gmra.mrb[88].mxu1 %v1939_v41  ;;  %v3931_v22 = vld [vmem:[%s4045_s20] ss:$0 sm:$0xff] }
 0x3cc   : > { %v1909_v51 = vadd.f32 %v1908_v47, %v3878_v28 }
 0x3cd   : > { %v1925_v53 = vpack.c.bf16 %v1907_v46, %v1903_v45 }
 0x3ce   : > { %v1926_v54 = vpack.c.bf16 %v1909_v51, %v1905_v49 }
 0x3cf   : > { %v1941_v61 = vmax.bf16 %v3289_v0, %v1925_v53 }
 0x3d0   : > { %v1942_v59 = vmax.bf16 %v3289_v0, %v1926_v54 }
 0x3d2   : > { %2166 = vmatprep.mubr.bf16.mxu1 %v1942_v59 }
 0x3d3   : > { %2167 = vmatmul.mubr.bf16.gmra.mrb[92].mxu1 %v1941_v61 }
 0x46e   : > { %v2644_v16 = vpop.f32.mrb[64].mxu1 }
 0x46f   : > { %v2645_v24 = vpop.f32.mrb[65].mxu1 }
 0x470   : > { %v2646_v38 = vadd.f32 %v2645_v24, %v2644_v16  ;;  %v2647_v63 = vpop.f32.mrb[66].mxu1 }
 0x471   : > { %v2648_v5 = vpop.f32.mrb[67].mxu1 }
 0x472   : > { %v2649_v28 = vadd.f32 %v2648_v5, %v2647_v63  ;;  %v2113_v6 = vadd.f32 %v2646_v38, %v3931_v22 }
 0x474   : > { %v2116_v8 = vadd.f32 %v2649_v28, %v3931_v22 }
 0x476   : > { %v2584_v15 = vpack.c.bf16 %v2116_v8, %v2113_v6  ;;  %v2650_v0 = vpop.f32.mrb[68].mxu1 }
 0x477   : > { %v2651_v17 = vpop.f32.mrb[69].mxu1 }
 0x478   : > { %2585 = vst [vmem:[%s3936_s23] sm:$0xff] %v2584_v15   ;;  %v2652_v18 = vadd.f32 %v2651_v17, %v2650_v0  ;;  %v2653_v25 = vpop.f32.mrb[70].mxu1 }
 0x479   : > { %v2654_v26 = vpop.f32.mrb[71].mxu1 }
 0x47a   : > { %v2655_v27 = vadd.f32 %v2654_v26, %v2653_v25  ;;  %v2121_v50 = vadd.f32 %v2652_v18, %v3931_v22 }
 0x47c   : > { %v2124_v10 = vadd.f32 %v2655_v27, %v3931_v22 }
 0x47e   : > { %v2589_v62 = vpack.c.bf16 %v2124_v10, %v2121_v50  ;;  %v2656_v4 = vpop.f32.mrb[72].mxu1 }
 0x47f   : > { %v2657_v21 = vpop.f32.mrb[73].mxu1 }
 0x480   : > { %2621 = vst [vmem:[%s3936_s23 + $0x8] sm:$0xff] %v2589_v62   ;;  %v2658_v30 = vadd.f32 %v2657_v21, %v2656_v4  ;;  %v2659_v44 = vpop.f32.mrb[74].mxu1 }
 0x481   : > { %v2660_v55 = vpop.f32.mrb[75].mxu1 }
 0x482   : > { %v2661_v58 = vadd.f32 %v2660_v55, %v2659_v44  ;;  %v2129_v1 = vadd.f32 %v2658_v30, %v3931_v22 }
 0x484   : > { %v2132_v7 = vadd.f32 %v2661_v58, %v3931_v22 }
 0x486   : > { %v2594_v14 = vpack.c.bf16 %v2132_v7, %v2129_v1  ;;  %v2662_v9 = vpop.f32.mrb[76].mxu1 }
 0x487   : > { %v2663_v20 = vpop.f32.mrb[77].mxu1 }
 0x488   : > { %2622 = vst [vmem:[%s3936_s23 + $0x10] sm:$0xff] %v2594_v14   ;;  %v2664_v36 = vadd.f32 %v2663_v20, %v2662_v9  ;;  %v2665_v42 = vpop.f32.mrb[78].mxu1 }
 0x489   : > { %v2666_v48 = vpop.f32.mrb[79].mxu1 }
 0x48a   : > { %v2667_v56 = vadd.f32 %v2666_v48, %v2665_v42  ;;  %v2137_v2 = vadd.f32 %v2664_v36, %v3931_v22 }
 0x48c   : > { %v2140_v13 = vadd.f32 %v2667_v56, %v3931_v22 }
 0x48e   : > { %v2599_v33 = vpack.c.bf16 %v2140_v13, %v2137_v2  ;;  %v2668_v43 = vpop.f32.mrb[80].mxu1 }
 0x48f   : > { %v2669_v52 = vpop.f32.mrb[81].mxu1 }
 0x490   : > { %2623 = vst [vmem:[%s3936_s23 + $0x18] sm:$0xff] %v2599_v33   ;;  %v2670_v60 = vadd.f32 %v2669_v52, %v2668_v43  ;;  %v2671_v29 = vpop.f32.mrb[82].mxu1 }
 0x491   : > { %v2672_v3 = vpop.f32.mrb[83].mxu1 }
 0x492   : > { %v2673_v31 = vadd.f32 %v2672_v3, %v2671_v29  ;;  %v2145_v12 = vadd.f32 %v2670_v60, %v3931_v22 }
 0x494   : > { %v2148_v23 = vadd.f32 %v2673_v31, %v3931_v22 }
 0x496   : > { %v2604_v39 = vpack.c.bf16 %v2148_v23, %v2145_v12  ;;  %v2674_v57 = vpop.f32.mrb[84].mxu1 }
 0x497   : > { %v2675_v11 = vpop.f32.mrb[85].mxu1 }
 0x498   : > { %2624 = vst [vmem:[%s3936_s23 + $0x20] sm:$0xff] %v2604_v39   ;;  %v2676_v19 = vadd.f32 %v2675_v11, %v2674_v57  ;;  %v2677_v35 = vpop.f32.mrb[86].mxu1 }
 0x499   : > { %v2678_v32 = vpop.f32.mrb[87].mxu1 }
 0x49a   : > { %v2679_v37 = vadd.f32 %v2678_v32, %v2677_v35  ;;  %v2153_v40 = vadd.f32 %v2676_v19, %v3931_v22 }
 0x49c   : > { %v2156_v41 = vadd.f32 %v2679_v37, %v3931_v22 }
 0x49e   : > { %v2609_v34 = vpack.c.bf16 %v2156_v41, %v2153_v40  ;;  %v2680_v45 = vpop.f32.mrb[88].mxu1 }
 0x49f   : > { %v2681_v46 = vpop.f32.mrb[89].mxu1 }
 0x4a0   : > { %2625 = vst [vmem:[%s3936_s23 + $0x28] sm:$0xff] %v2609_v34   ;;  %v2682_v47 = vadd.f32 %v2681_v46, %v2680_v45  ;;  %v2683_v49 = vpop.f32.mrb[90].mxu1 }
 0x4a1   : > { %v2684_v51 = vpop.f32.mrb[91].mxu1 }
 0x4a2   : > { %v2685_v53 = vadd.f32 %v2684_v51, %v2683_v49  ;;  %v2161_v54 = vadd.f32 %v2682_v47, %v3931_v22 }
 0x4a4   : > { %v2164_v59 = vadd.f32 %v2685_v53, %v3931_v22 }
 0x4a6   : > { %v2614_v61 = vpack.c.bf16 %v2164_v59, %v2161_v54  ;;  %v2686_v16 = vpop.f32.mrb[92].mxu1 }
 0x4a7   : > { %v2687_v24 = vpop.f32.mrb[93].mxu1 }
 0x4a8   : > { %2626 = vst [vmem:[%s3936_s23 + $0x30] sm:$0xff] %v2614_v61   ;;  %v2688_v38 = vadd.f32 %v2687_v24, %v2686_v16  ;;  %v2689_v63 = vpop.f32.mrb[94].mxu1 }
 0x4a9   : > { %v2690_v5 = vpop.f32.mrb[95].mxu1 }
 0x4aa   : > { %v2691_v28 = vadd.f32 %v2690_v5, %v2689_v63  ;;  %v2169_v6 = vadd.f32 %v2688_v38, %v3931_v22 }
 0x4ac   : > { %v2172_v8 = vadd.f32 %v2691_v28, %v3931_v22 }
 0x4ae   : > { %v2619_v15 = vpack.c.bf16 %v2172_v8, %v2169_v6 }
 0x4b0   : > { %2627 = vst [vmem:[%s3936_s23 + $0x38] sm:$0xff] %v2619_v15  }
 0x4b1   : > { %3215 = shalt.err (!%p3212_p13)
}
 0x4b2   : > { %s3216_s22 = scalar_lea.hbm %s3964_s17, 1024  ;;  %s3220_s18 = scalar_lea.hbm %s4046_s15, 2048 }
 0x4b3   : > { %p3217_p0 = scmp.ne.s32.totalorder %s3964_s17, %s3216_s22  ;;  %p3221_p1 = scmp.lt.u32.totalorder %s3964_s17, %s4046_s15 }
 0x4b4   : > { %p3222_p2 = scmp.lt.u32.totalorder %s3220_s18, %s3216_s22  ;;  %p3224_p6 = scmp.lt.u32.totalorder %s3216_s22, %s3964_s17 }
 0x4b5   : > { %p3218_p5 = pnand %p3217_p0, %p3494_p8 }
 0x4b6   : > { %p3223_p4 = por %p3222_p2, %p3221_p1 }
 0x4b7   : > { %p3219_p11 = pneg %p3218_p5 }
 0x4b8   : > { %p3225_p10 = por %p3224_p6, %p3223_p4 }
 0x4ba   : > { %p3226_p12 = pnand %p3225_p10, %p3219_p11 }
 0x4bc   : > { %3229 = shalt.err (!%p3226_p12)
}
 0x4bd   : > { %s3291_s29 = smov 64   ;;  %s3292_s14 = smov 4  }
 0x4be   : > { %2774 = dma.vmem_to_hbm [thread:$0]  (%p3494_p8), %s3966_s9, 1024, %s3964_s17, %s2256_s30, %s3291_s29, %s3291_s29, %s3292_s14  }
 0x4bf PF: > { %s4047_s21 = sld [smem:[#allocation16_spill]]  ;;  %s4048_s13 = sld [smem:[#allocation17_spill]] }
 0x4c0   : > { %p4050_p7 = scmp.ge.s32.totalorder %s3276_s12, 2 }
 0x4c5   : > { %s2284_s27 = sand.u32 1, %s4047_s21   ;;  %p4049_p3 = scmp.ne.s32.totalorder %s4048_s13, 0 }
 0x4c6   : > { %s2285_s28 = scalar_lea.sflag [#allocation4], %s2284_s27 }
 0x4c7   : > { %p2794_p9 = pnand %p4050_p7, %p4049_p3 }
 0x4c9   : > { %3259 = dma.done.wait (!%p2794_p9), %s2285_s28, 1024  }
 0x4ca   : > { %3261 = vsyncadd (!%p2794_p9), %s2285_s28, 4294966272  ;;  %p24_p13 = scmp.ge.s32.totalorder %s3481_s8, 4   ;;  %s4051_s30 = smov %s3268_s10 }
 0x4cb   : > { %s4052_s10 = smov %s3272_s11  ;;  %s4053_s11 = smov %s3490_s24 }
 0x4cc   : > { %s4054_s12 = smov %s3481_s8  ;;  %26 = sbr.rel (!%p24_p13) target bundleno = 10 (0xa), region = 117 }
 0x4d3   :  { %2290 = vsyncpa [#allocation3], 1 }
 0x4d4   :  { %2292 = vsyncpa [#allocation3 + $0x1], 1 }
 0x4d5   :  { %2293 = vsyncpa [#allocation6], 1 }
 0x4d6   :  { %2294 = vsyncpa [#allocation9], 1 }
 0x4d7   :  { %2295 = vsyncpa [#allocation4], 1 }
 0x4d8   :  { %2297 = vsyncpa [#allocation4 + $0x1], 1 }

</bundles_post_ra>
